<compile_context>
chip_gen: v7x
topology: tpu7x:2x2x1
jax: 0.10.0
libtpu: 0.0.40
codegen_flags: <defaults>
</compile_context>

<pallas_src>
import math
from functools import partial

import jax
import jax.numpy as jnp
from jax.experimental import pallas as pl
from jax.experimental.pallas import tpu as pltpu


def fe_cnn3d_kernel(xwin_ref, w_ref, bias_ref, gamma_ref, beta_ref, out_ref,
                    *, eps, n_norm):
    # xwin_ref : (1, Mb, K)        temporal windows for Mb (b, t_out) slices
    # w_ref    : (K, HWC)          scatter-expanded conv weight (resident in VMEM)
    # bias_ref / gamma_ref / beta_ref : (1, HWC)   lane-dense per-(h,w,c) vectors
    # out_ref  : (1, Mb, HWC)

    # --- Conv3d as one dense matmul on the MXU (produces lane-dense layout) ---
    z = jnp.dot(xwin_ref[0], w_ref[...], preferred_element_type=jnp.float32)
    z = z + bias_ref[...]                           # conv bias, (Mb, HWC)

    # MaxPool3d((1,1,1), stride (1,1,1)) is the identity.

    # --- LayerNorm over [Cout, H_out, W_out] per (b, t_out) slice (one pass) ---
    inv_n = 1.0 / n_norm
    mean = jnp.sum(z, axis=-1, keepdims=True) * inv_n            # (Mb, 1)
    ex2 = jnp.sum(z * z, axis=-1, keepdims=True) * inv_n         # (Mb, 1)
    var = ex2 - mean * mean                                      # biased (torch default)
    inv = jax.lax.rsqrt(var + eps)
    y = (z - mean) * inv * gamma_ref[...] + beta_ref[...]

    # --- exact GELU (erf formulation, matches torch.nn.GELU default) ---
    g = 0.5 * y * (1.0 + jax.lax.erf(y * (1.0 / math.sqrt(2.0))))

    out_ref[0] = g.astype(out_ref.dtype)


def _expanded_conv_weight(conv_w, H, W, Ho, Wo, ss):
    """Scatter the (Cout, Cin, kt, ks, ks) conv weight into a dense matmul weight
    Wbig of shape (Cin*kt*H*W, Ho*Wo*Cout) such that the strided 'valid' conv over a
    full (kt, H, W) temporal window is a single matmul.  Built once (weights are static)."""
    Cout, Cin, kt, ks, _ = conv_w.shape
    a = jnp.arange(ks)
    # Eh[a, h, p] = 1 iff h == p*ss + a   (spatial gather for the H axis)
    Eh = (jnp.arange(H)[None, :, None] ==
          (jnp.arange(Ho)[None, None, :] * ss + a[:, None, None])).astype(conv_w.dtype)
    # Ew[b, w, q] = 1 iff w == q*ss + b
    Ew = (jnp.arange(W)[None, :, None] ==
          (jnp.arange(Wo)[None, None, :] * ss + a[:, None, None])).astype(conv_w.dtype)
    # Wbig[i, t, h, w, p, q, c] = sum_{a,b} w[c,i,t,a,b] * [h == p*ss+a] * [w == q*ss+b]
    wbig = jnp.einsum('citab,ahp,bwq->ithwpqc', conv_w, Eh, Ew)
    return wbig.reshape(Cin * kt * H * W, Ho * Wo * Cout)


def fe_cnn3d_forward(x, conv_w, conv_b, ln_gamma, ln_beta, *,
                     kt, ks, st, ss, eps=1e-5, use_bf16_matmul=False):
    """x: (B, Cin, T, H, W) NCDHW.  Returns (B, Cout, T_out, H_out, W_out)."""
    B, Cin, T, H, W = x.shape
    Cout = conv_w.shape[0]
    To = (T - kt) // st + 1
    Ho = (H - ks) // ss + 1
    Wo = (W - ks) // ss + 1
    K = Cin * kt * H * W            # 768 at the demo shapes (128-aligned)
    HWC = Ho * Wo * Cout            # 512 at the demo shapes (lane-dense, 128-aligned)
    M = B * To

    # --- per-call data prep: only kt temporal slices (no 147-tap im2col round-trip) ---
    wins = jnp.stack([x[:, :, dt:dt + st * To:st] for dt in range(kt)], axis=3)
    # (B, Cin, To, kt, H, W) -> (B, To, Cin, kt, H, W) -> (B*To, Cin*kt*H*W)
    wins = jnp.transpose(wins, (0, 2, 1, 3, 4, 5)).reshape(M, K)

    # --- static parameter repacking (one-time, weight-only transforms) ---
    wbig = _expanded_conv_weight(conv_w, H, W, Ho, Wo, ss)                     # (K, HWC)
    bias_dense = jnp.broadcast_to(conv_b, (Ho, Wo, Cout)).reshape(1, HWC)      # (1, HWC)
    gamma_dense = jnp.transpose(ln_gamma, (1, 2, 0)).reshape(1, HWC)           # (1, HWC)
    beta_dense = jnp.transpose(ln_beta, (1, 2, 0)).reshape(1, HWC)             # (1, HWC)

    if use_bf16_matmul:   # v6e/v7x MXU option at production sizes; f32 accumulation kept.
        wins = wins.astype(jnp.bfloat16)
        wbig = wbig.astype(jnp.bfloat16)

    # Two macro-blocks so v7x megacore can shard them; 1 block if B*To is odd.
    nblocks = 2 if (M % 2 == 0) else 1
    Mb = M // nblocks
    wins3 = wins.reshape(nblocks, Mb, K)

    itemsize = 4
    cost = pl.CostEstimate(
        flops=2 * M * K * HWC + 12 * M * HWC,
        transcendentals=2 * M * HWC,
        bytes_accessed=(M * K + K * HWC + 3 * HWC + M * HWC) * itemsize,
    )

    out = pl.pallas_call(
        partial(fe_cnn3d_kernel, eps=eps, n_norm=float(HWC)),
        out_shape=jax.ShapeDtypeStruct((nblocks, Mb, HWC), x.dtype),
        grid_spec=pltpu.PrefetchScalarGridSpec(
            num_scalar_prefetch=0,
            grid=(nblocks,),
            in_specs=[
                pl.BlockSpec((1, Mb, K), lambda i: (i, 0, 0)),    # temporal windows
                pl.BlockSpec((K, HWC), lambda i: (0, 0)),         # expanded conv weight (resident)
                pl.BlockSpec((1, HWC), lambda i: (0, 0)),         # conv bias (lane-dense)
                pl.BlockSpec((1, HWC), lambda i: (0, 0)),         # layernorm gamma (lane-dense)
                pl.BlockSpec((1, HWC), lambda i: (0, 0)),         # layernorm beta (lane-dense)
            ],
            out_specs=pl.BlockSpec((1, Mb, HWC), lambda i: (i, 0, 0)),
        ),
        compiler_params=pltpu.CompilerParams(
            dimension_semantics=("parallel",)),
        cost_estimate=cost,
    )(wins3, wbig, bias_dense, gamma_dense, beta_dense)

    out = out.reshape(B, To, Ho, Wo, Cout)
    out = jnp.transpose(out, (0, 4, 1, 2, 3))        # back to NCDHW (B, Cout, To, Ho, Wo)
    return out


if __name__ == "__main__":
    # Small shapes consistent with layer_id=0 of the config:
    #   Cin=1, Cout=conv_dim[0]=32, kernel=(3,7,7), stride=(1,3,3), maxpool (1,1,1) identity.
    B, Cin, T, H, W = 2, 1, 8, 16, 16
    Cout, kt, ks, st, ss = 32, 3, 7, 1, 3

    To = (T - kt) // st + 1          # 6
    Ho = (H - ks) // ss + 1          # 4  (== dim_cnnMpOut at these shapes)
    Wo = Ho

    key = jax.random.PRNGKey(0)
    kx, kw, kb = jax.random.split(key, 3)
    x = jax.random.normal(kx, (B, Cin, T, H, W), dtype=jnp.float32)

    # Deterministic synthetic parameters (no checkpoint).
    fan_in = Cin * kt * ks * ks
    conv_w = jax.random.normal(kw, (Cout, Cin, kt, ks, ks), dtype=jnp.float32) / math.sqrt(fan_in)
    conv_b = jax.random.normal(kb, (Cout,), dtype=jnp.float32) * 0.01
    ln_gamma = jnp.ones((Cout, Ho, Wo), dtype=jnp.float32)   # nn.LayerNorm default init
    ln_beta = jnp.zeros((Cout, Ho, Wo), dtype=jnp.float32)

    out = fe_cnn3d_forward(x, conv_w, conv_b, ln_gamma, ln_beta,
                           kt=kt, ks=ks, st=st, ss=ss)
    jax.block_until_ready(out)
    assert out.shape == (B, Cout, To, Ho, Wo), out.shape
    print("KERNEL_OK")
</pallas_src>

<mosaic_0001>
module attributes {stable_mosaic.version = 11 : i64} {
  func.func @fe_cnn3d_kernel(%arg0: i32, %arg1: memref<1x6x768xf32, #tpu.memory_space<vmem>>, %arg2: memref<768x512xf32, #tpu.memory_space<vmem>>, %arg3: memref<1x512xf32, #tpu.memory_space<vmem>>, %arg4: memref<1x512xf32, #tpu.memory_space<vmem>>, %arg5: memref<1x512xf32, #tpu.memory_space<vmem>>, %arg6: memref<1x6x512xf32, #tpu.memory_space<vmem>>) attributes {dimension_semantics = [#tpu.dimension_semantics<parallel>], iteration_bounds = array<i64: 2>, scalar_prefetch = 0 : i64, scratch_operands = 0 : i64, tpu.core_type = #tpu.core_type<tc>, window_params = [{transform_indices = @transform_0, window_bounds = array<i64: 1, 6, 768>}, {pipeline_mode = #tpu.pipeline_mode<synchronous>, transform_indices = @transform_1, window_bounds = array<i64: 768, 512>}, {pipeline_mode = #tpu.pipeline_mode<synchronous>, transform_indices = @transform_2, window_bounds = array<i64: 1, 512>}, {pipeline_mode = #tpu.pipeline_mode<synchronous>, transform_indices = @transform_3, window_bounds = array<i64: 1, 512>}, {pipeline_mode = #tpu.pipeline_mode<synchronous>, transform_indices = @transform_4, window_bounds = array<i64: 1, 512>}, {transform_indices = @transform_5, window_bounds = array<i64: 1, 6, 512>}]} {
    %c0 = arith.constant 0 : index
    %c0_0 = arith.constant 0 : index
    %c0_1 = arith.constant 0 : index
    %0 = vector.load %arg1[%c0, %c0_0, %c0_1] : memref<1x6x768xf32, #tpu.memory_space<vmem>>, vector<1x6x768xf32>
    %1 = vector.shape_cast %0 : vector<1x6x768xf32> to vector<6x768xf32>
    %c0_2 = arith.constant 0 : index
    %c0_3 = arith.constant 0 : index
    %2 = vector.load %arg2[%c0_2, %c0_3] : memref<768x512xf32, #tpu.memory_space<vmem>>, vector<768x512xf32>
    %cst = arith.constant dense<0.000000e+00> : vector<6x512xf32>
    %3 = tpu.matmul %1, %2, %cst {dimension_numbers = #tpu.dot_dimension_numbers<[1], [0], [0], [1], [0, 0, 1, 1], [], []>} : vector<6x768xf32>, vector<768x512xf32>, vector<6x512xf32> -> vector<6x512xf32>
    %c0_4 = arith.constant 0 : index
    %c0_5 = arith.constant 0 : index
    %4 = vector.load %arg3[%c0_4, %c0_5] : memref<1x512xf32, #tpu.memory_space<vmem>>, vector<1x512xf32>
    %5 = vector.broadcast %4 : vector<1x512xf32> to vector<6x512xf32>
    %6 = arith.addf %3, %5 : vector<6x512xf32>
    %cst_6 = arith.constant dense<0.000000e+00> : vector<6xf32>
    %7 = vector.multi_reduction <add>, %6, %cst_6 [1] : vector<6x512xf32> to vector<6xf32>
    %8 = vector.shape_cast %7 : vector<6xf32> to vector<6x1xf32>
    %cst_7 = arith.constant 0.001953125 : f32
    %9 = vector.broadcast %cst_7 : f32 to vector<6x1xf32>
    %10 = arith.mulf %8, %9 : vector<6x1xf32>
    %11 = arith.mulf %6, %6 : vector<6x512xf32>
    %cst_8 = arith.constant dense<0.000000e+00> : vector<6xf32>
    %12 = vector.multi_reduction <add>, %11, %cst_8 [1] : vector<6x512xf32> to vector<6xf32>
    %13 = vector.shape_cast %12 : vector<6xf32> to vector<6x1xf32>
    %cst_9 = arith.constant 0.001953125 : f32
    %14 = vector.broadcast %cst_9 : f32 to vector<6x1xf32>
    %15 = arith.mulf %13, %14 : vector<6x1xf32>
    %16 = arith.mulf %10, %10 : vector<6x1xf32>
    %17 = arith.subf %15, %16 : vector<6x1xf32>
    %cst_10 = arith.constant 9.99999974E-6 : f32
    %18 = vector.broadcast %cst_10 : f32 to vector<6x1xf32>
    %19 = arith.addf %17, %18 : vector<6x1xf32>
    %20 = math.rsqrt %19 : vector<6x1xf32>
    %21 = vector.broadcast %10 : vector<6x1xf32> to vector<6x512xf32>
    %22 = arith.subf %6, %21 : vector<6x512xf32>
    %23 = vector.broadcast %20 : vector<6x1xf32> to vector<6x512xf32>
    %24 = arith.mulf %22, %23 : vector<6x512xf32>
    %c0_11 = arith.constant 0 : index
    %c0_12 = arith.constant 0 : index
    %25 = vector.load %arg4[%c0_11, %c0_12] : memref<1x512xf32, #tpu.memory_space<vmem>>, vector<1x512xf32>
    %26 = vector.broadcast %25 : vector<1x512xf32> to vector<6x512xf32>
    %27 = arith.mulf %24, %26 : vector<6x512xf32>
    %c0_13 = arith.constant 0 : index
    %c0_14 = arith.constant 0 : index
    %28 = vector.load %arg5[%c0_13, %c0_14] : memref<1x512xf32, #tpu.memory_space<vmem>>, vector<1x512xf32>
    %29 = vector.broadcast %28 : vector<1x512xf32> to vector<6x512xf32>
    %30 = arith.addf %27, %29 : vector<6x512xf32>
    %cst_15 = arith.constant 5.000000e-01 : f32
    %31 = vector.broadcast %cst_15 : f32 to vector<6x512xf32>
    %32 = arith.mulf %31, %30 : vector<6x512xf32>
    %cst_16 = arith.constant 0.707106769 : f32
    %33 = vector.broadcast %cst_16 : f32 to vector<6x512xf32>
    %34 = arith.mulf %30, %33 : vector<6x512xf32>
    %35 = math.erf %34 : vector<6x512xf32>
    %cst_17 = arith.constant 1.000000e+00 : f32
    %36 = vector.broadcast %cst_17 : f32 to vector<6x512xf32>
    %37 = arith.addf %36, %35 : vector<6x512xf32>
    %38 = arith.mulf %32, %37 : vector<6x512xf32>
    %c0_18 = arith.constant 0 : index
    %c0_19 = arith.constant 0 : index
    %c0_20 = arith.constant 0 : index
    %39 = vector.load %arg6[%c0_18, %c0_19, %c0_20] : memref<1x6x512xf32, #tpu.memory_space<vmem>>, vector<1x6x512xf32>
    %40 = vector.shape_cast %39 : vector<1x6x512xf32> to vector<6x512xf32>
    %41 = vector.shape_cast %38 : vector<6x512xf32> to vector<1x6x512xf32>
    tpu.vector_store %arg6[%c0_18, %c0_19, %c0_20], %41 {strides = array<i32>} : memref<1x6x512xf32, #tpu.memory_space<vmem>>, vector<1x6x512xf32>,
    return
  }
  func.func @transform_0(%arg0: i32) -> (i32, i32, i32) {
    %c0_i32 = arith.constant 0 : i32
    %c0_i32_0 = arith.constant 0 : i32
    %c0_i32_1 = arith.constant 0 : i32
    return %arg0, %c0_i32, %c0_i32_0 : i32, i32, i32
  }
  func.func @transform_1(%arg0: i32) -> (i32, i32) {
    %c0_i32 = arith.constant 0 : i32
    %c0_i32_0 = arith.constant 0 : i32
    %c0_i32_1 = arith.constant 0 : i32
    return %c0_i32, %c0_i32_0 : i32, i32
  }
  func.func @transform_2(%arg0: i32) -> (i32, i32) {
    %c0_i32 = arith.constant 0 : i32
    %c0_i32_0 = arith.constant 0 : i32
    %c0_i32_1 = arith.constant 0 : i32
    return %c0_i32, %c0_i32_0 : i32, i32
  }
  func.func @transform_3(%arg0: i32) -> (i32, i32) {
    %c0_i32 = arith.constant 0 : i32
    %c0_i32_0 = arith.constant 0 : i32
    %c0_i32_1 = arith.constant 0 : i32
    return %c0_i32, %c0_i32_0 : i32, i32
  }
  func.func @transform_4(%arg0: i32) -> (i32, i32) {
    %c0_i32 = arith.constant 0 : i32
    %c0_i32_0 = arith.constant 0 : i32
    %c0_i32_1 = arith.constant 0 : i32
    return %c0_i32, %c0_i32_0 : i32, i32
  }
  func.func @transform_5(%arg0: i32) -> (i32, i32, i32) {
    %c0_i32 = arith.constant 0 : i32
    %c0_i32_0 = arith.constant 0 : i32
    %c0_i32_1 = arith.constant 0 : i32
    return %arg0, %c0_i32, %c0_i32_0 : i32, i32, i32
  }
}

</mosaic_0001>

<bundles_post_ra>
// kernel: tpu_custom_call.1
= control target key start
LH: loop header
LB: loop body
LE: loop exit
PB: predicated region body
PF: predicated region fallthrough
CT: control target
= control target key end

     0   :  { %10 = vsyncpa [#allocation3], 0  ;;  %s2162_s0 = inlined_call_operand.vmem [shape: f32[2,6,768], index: 0, kind: input, shape index: {}]   ;;  %s2163_s1 = inlined_call_operand.hbm [shape: f32[768,512], index: 1, kind: input, shape index: {}]   ;;  %s2164_s2 = inlined_call_operand.hbm [shape: f32[1,512], index: 2, kind: input, shape index: {}]   ;;  %s2165_s3 = inlined_call_operand.hbm [shape: f32[1,512], index: 3, kind: input, shape index: {}]   ;;  %s2166_s4 = inlined_call_operand.hbm [shape: f32[1,512], index: 4, kind: input, shape index: {}]   ;;  %s2167_s5 = inlined_call_operand.vmem [shape: f32[2,6,512], index: 5, kind: output, shape index: {}]  }
   0x1   :  { %11 = vsyncpa [#allocation5], 0 }
   0x2   :  { %12 = vsyncpa [#allocation8], 0  ;;  %s1970_s18 = smov 0  }
   0x3 LB: > { %s1934_s19 = smov [#allocation4]   ;;  %s1976_s21 = sadd.s32 4294967295, %s1932_s18   ;;  %s1932_s18 = sphi %s1970_s18, %s18_s18  }
   0x4   : > { %s185_s20 = sshll.u32 %s1934_s19, 4  ;;  %p1327_p0 = scmp.ge.s32.totalorder %s1932_s18, 1  ;;  %s1981_s20 = int_to_ptr.vmem [resolvable:$true] %s185_s20 }
   0x5   : > { %p159_p1 = scmp.lt.s32.totalorder %s1932_s18, 3  ;;  %p2168_p2 = scmp.eq.s32.totalorder %s1976_s21, 0 }
   0x6   : > { %s1935_s23 = smov [#allocation2]   ;;  %s1936_s26 = smov [#allocation6]  }
   0x7   : > { %p1983_p3 = pnand %p1327_p0, %p159_p1  ;;  %s171_s24 = sshll.u32 %s1935_s23, 4  ;;  %s1989_s24 = int_to_ptr.vmem [resolvable:$true] %s171_s24 }
   0x8   : > { %s196_s27 = sshll.u32 %s1936_s26, 4  ;;  %s1937_s28 = smov [#allocation7]   ;;  %s1997_s27 = int_to_ptr.vmem [resolvable:$true] %s196_s27 }
   0x9   : > { %s2170_s22 = scalar_select %p1983_p3, 1, 0 }
   0xa   : > { %p1757_p4 = pneg %p1983_p3  ;;  %s1999_s29 = sshll.u32 %s1937_s28, 4  ;;  %s208_s29 = int_to_ptr.vmem [resolvable:$true] %s1999_s29 }
   0xb   : > { %s1802_s7 = scalar_lea.hbm %s2164_s2, 64 }
   0xc   : > { %p1993_p5 = pnand %p2168_p2, %p1757_p4  ;;  %p1803_p6 = scmp.ne.s32.totalorder %s2164_s2, %s1802_s7 }
   0xd   : > { %p1809_p10 = scmp.lt.u32.totalorder %s1802_s7, %s2164_s2 }
   0xe   : > { %p2009_p7 = pneg %p1993_p5 }
  0x10   : > { %p1805_p8 = pnand %p2009_p7, %p1803_p6 }
  0x12   : > { %p1806_p9 = pneg %p1805_p8 }
  0x14   : > { %p1811_p11 = pnand %p1809_p10, %p1806_p9 }
  0x16   : > { %1814 = shalt.err (!%p1811_p11)
}
  0x17   : > { %s1815_s13 = scalar_lea.vmem %s1981_s20, 64  ;;  %p1823_p1 = scmp.lt.s32.totalorder %s1981_s20, %s1981_s20 }
  0x18   : > { %p1816_p12 = scmp.ne.s32.totalorder %s1981_s20, %s1815_s13  ;;  %p1824_p4 = scmp.lt.s32.totalorder %s1815_s13, %s1815_s13 }
  0x1a   : > { %p1818_p13 = pnand %p1816_p12, %p2009_p7  ;;  %p1825_p6 = por %p1824_p4, %p1823_p1 }
  0x1c   : > { %p1819_p0 = pneg %p1818_p13 }
  0x1e   : > { %p1826_p8 = pnand %p1825_p6, %p1819_p0 }
  0x20   : > { %1829 = shalt.err (!%p1826_p8)
}
  0x21   : > { %1763 = dma.hbm_to_vmem [thread:$0]  (!%p1993_p5), %s2164_s2, 64, %s1981_s20, [#allocation5]  }
  0x22   : > { %s1830_s19 = scalar_lea.hbm %s2163_s1, 49152 }
  0x23   : > { %p1831_p9 = scmp.ne.s32.totalorder %s2163_s1, %s1830_s19  ;;  %p1837_p12 = scmp.lt.u32.totalorder %s1830_s19, %s2163_s1 }
  0x25   : > { %p1833_p10 = pnand %p1831_p9, %p2009_p7 }
  0x27   : > { %p1834_p11 = pneg %p1833_p10 }
  0x29   : > { %p1839_p13 = pnand %p1837_p12, %p1834_p11 }
  0x2b   : > { %1842 = shalt.err (!%p1839_p13)
}
  0x2c   : > { %s1843_s20 = scalar_lea.vmem %s1989_s24, 49152  ;;  %p1851_p6 = scmp.lt.s32.totalorder %s1989_s24, %s1989_s24 }
  0x2d   : > { %p1844_p0 = scmp.ne.s32.totalorder %s1989_s24, %s1843_s20  ;;  %p1852_p8 = scmp.lt.s32.totalorder %s1843_s20, %s1843_s20 }
  0x2f   : > { %p1846_p1 = pnand %p1844_p0, %p2009_p7  ;;  %p1853_p9 = por %p1852_p8, %p1851_p6 }
  0x31   : > { %p1847_p4 = pneg %p1846_p1 }
  0x33   : > { %p1854_p10 = pnand %p1853_p9, %p1847_p4 }
  0x35   : > { %1857 = shalt.err (!%p1854_p10)
}
  0x36   : > { %s1938_s6 = smov 512   ;;  %s1939_s7 = smov 32  }
  0x37   : > { %1760 = dma.hbm_to_vmem [thread:$0]  (!%p1993_p5), %s2163_s1, 49152, %s1989_s24, [#allocation3], %s1938_s6, %s1938_s6, %s1939_s7  }
  0x38   : > { %s1858_s13 = scalar_lea.hbm %s2165_s3, 64 }
  0x39   : > { %p1859_p11 = scmp.ne.s32.totalorder %s2165_s3, %s1858_s13  ;;  %p1865_p0 = scmp.lt.u32.totalorder %s1858_s13, %s2165_s3 }
  0x3b   : > { %p1861_p12 = pnand %p1859_p11, %p2009_p7 }
  0x3d   : > { %p1862_p13 = pneg %p1861_p12 }
  0x3f   : > { %p1867_p1 = pnand %p1865_p0, %p1862_p13 }
  0x41   : > { %1870 = shalt.err (!%p1867_p1)
}
  0x42   : > { %s1871_s24 = scalar_lea.vmem %s1997_s27, 64  ;;  %p1879_p9 = scmp.lt.s32.totalorder %s1997_s27, %s1997_s27 }
  0x43   : > { %p1872_p4 = scmp.ne.s32.totalorder %s1997_s27, %s1871_s24  ;;  %p1880_p10 = scmp.lt.s32.totalorder %s1871_s24, %s1871_s24 }
  0x45   : > { %p1874_p6 = pnand %p1872_p4, %p2009_p7  ;;  %p1881_p11 = por %p1880_p10, %p1879_p9 }
  0x47   : > { %p1875_p8 = pneg %p1874_p6 }
  0x49   : > { %p1882_p12 = pnand %p1881_p11, %p1875_p8 }
  0x4b   : > { %1885 = shalt.err (!%p1882_p12)
}
  0x4c   : > { %1766 = dma.hbm_to_vmem [thread:$0]  (!%p1993_p5), %s2165_s3, 64, %s1997_s27, [#allocation5]  }
  0x4d   : > { %s1886_s30 = scalar_lea.hbm %s2166_s4, 64 }
  0x4e   : > { %p1887_p13 = scmp.ne.s32.totalorder %s2166_s4, %s1886_s30  ;;  %p1893_p4 = scmp.lt.u32.totalorder %s1886_s30, %s2166_s4 }
  0x50   : > { %p1889_p0 = pnand %p1887_p13, %p2009_p7 }
  0x52   : > { %p1890_p1 = pneg %p1889_p0 }
  0x54   : > { %p1895_p6 = pnand %p1893_p4, %p1890_p1 }
  0x56   : > { %1898 = shalt.err (!%p1895_p6)
}
  0x57   : > { %s1899_s9 = scalar_lea.vmem %s208_s29, 64  ;;  %p1907_p11 = scmp.lt.s32.totalorder %s208_s29, %s208_s29 }
  0x58   : > { %p1900_p8 = scmp.ne.s32.totalorder %s208_s29, %s1899_s9  ;;  %p1908_p12 = scmp.lt.s32.totalorder %s1899_s9, %s1899_s9 }
  0x5a   : > { %p1902_p9 = pnand %p1900_p8, %p2009_p7  ;;  %p1909_p2 = por %p1908_p12, %p1907_p11 }
  0x5c   : > { %p1903_p10 = pneg %p1902_p9 }
  0x5e   : > { %p1910_p3 = pnand %p1909_p2, %p1903_p10 }
  0x60   : > { %1913 = shalt.err (!%p1910_p3)
}
  0x61   : > { %1769 = dma.hbm_to_vmem [thread:$0]  (!%p1993_p5), %s2166_s4, 64, %s208_s29, [#allocation8]  }
  0x62   : > { %p2173_p13 = scmp.ne.s32.totalorder %s2170_s22, 0 }
  0x63   : > { %p2174_p0 = scmp.eq.s32.totalorder (!%p2173_p13), %s1976_s21, 0 }
  0x64   : > { %228 = sbr.rel (%p2173_p13) target bundleno = 722 (0x2d2), region = 40 }
  0x6b   : > { %1919 = dma.done.wait (%p2174_p0), [#allocation3], 49152   ;;  %p2175_p7 = pmov %p2174_p0 }
  0x6c   : > { %p2176_p1 = pmov %p2174_p0 }
  0x6d   : > { %1921 = vsyncadd (%p2175_p7), [#allocation3], 4294918144 }
  0x6e   : > { %1923 = dma.done.wait (%p2176_p1), [#allocation5], 128   ;;  %p2177_p2 = pmov %p2174_p0 }
  0x6f   : > { %p2178_p3 = pmov %p2174_p0 }
  0x70   : > { %1925 = vsyncadd (%p2177_p2), [#allocation5], 4294967168 }
  0x71   : > { %1927 = dma.done.wait (%p2178_p3), [#allocation8], 64   ;;  %p2179_p5 = pmov %p2174_p0 }
  0x72   : > { %v285_v0 = vld [vmem:[#allocation2 + $0x8] sm:$0xff]  ;;  %v287_v2 = vld [vmem:[#allocation2 + $0x18] sm:$0xff]  ;;  %v284_v5 = vld [vmem:[#allocation2] sm:$0xff]  ;;  %p268_p4 = scmp.lt.s32.totalorder %s1976_s21, 1  ;;  %vm1116_vm0 = vcmask 1045504  }
  0x73   : > { %1929 = vsyncadd (%p2179_p5), [#allocation8], 4294967232  ;;  %v289_v1 = vld [vmem:[#allocation2 + $0x28] sm:$0xff]  ;;  %v291_v4 = vld [vmem:[#allocation2 + $0x38] sm:$0xff] }
  0x74   : > { %v1344_v3 = vpack.c.bf16 %v289_v1, %v285_v0  ;;  %v288_v6 = vld [vmem:[#allocation2 + $0x20] sm:$0xff]  ;;  %v1536_v7 = vpack.c.bf16 %v291_v4, %v287_v2  ;;  %v286_v9 = vld [vmem:[#allocation2 + $0x10] sm:$0xff]  ;;  %v293_v11 = vld [vmem:[#allocation2 + $0x48] sm:$0xff]  ;;  %s2181_s21 = smov (!%p268_p4, %s1976_s21), 1 }
  0x75   : > { %v1346_v8 = vpack.c.bf16 %v288_v6, %v284_v5  ;;  %v290_v10 = vld [vmem:[#allocation2 + $0x30] sm:$0xff]  ;;  %v297_v13 = vld [vmem:[#allocation2 + $0x68] sm:$0xff]  ;;  %v295_v14 = vld [vmem:[#allocation2 + $0x58] sm:$0xff]  ;;  %s1740_s22 = smul.u32 48, %s2181_s21  ;;  %s1343_s12 = sshll.u32 %s2181_s21, 5 }
  0x76   : > { %1345 = vmatprep.subr.bf16.mxu0 %v1344_v3  ;;  %v1538_v12 = vpack.c.bf16 %v290_v10, %v286_v9  ;;  %v299_v15 = vld [vmem:[#allocation2 + $0x78] sm:$0xff]  ;;  %1537 = vmatprep.subr.bf16.mxu1 %v1536_v7  ;;  %v1348_v16 = vpack.c.bf16 %v297_v13, %v293_v11  ;;  %v292_v18 = vld [vmem:[#allocation2 + $0x40] sm:$0xff]  ;;  %v294_v20 = vld [vmem:[#allocation2 + $0x50] sm:$0xff]  ;;  %s277_s15 = scalar_lea.vmem %s2167_s5, %s1343_s12 }
  0x77   : > { %1347 = vmatpush1.bf16.msra.mxu0 %v1346_v8  ;;  %v1540_v17 = vpack.c.bf16 %v299_v15, %v295_v14  ;;  %v296_v19 = vld [vmem:[#allocation2 + $0x60] sm:$0xff]  ;;  %v298_v22 = vld [vmem:[#allocation2 + $0x70] sm:$0xff]  ;;  %v301_v23 = vld [vmem:[#allocation2 + $0x88] sm:$0xff]  ;;  %s2119_s10 = scalar_lea.vmem %s2162_s0, %s1740_s22 }
  0x78   : > { %1539 = vmatpush1.bf16.msra.mxu1 %v1538_v12  ;;  %v1350_v21 = vpack.c.bf16 %v296_v19, %v292_v18  ;;  %v305_v24 = vld [vmem:[#allocation2 + $0xa8] sm:$0xff]  ;;  %1349 = vmatprep.subr.bf16.mxu0 %v1348_v16  ;;  %v1542_v25 = vpack.c.bf16 %v298_v22, %v294_v20  ;;  %v303_v27 = vld [vmem:[#allocation2 + $0x98] sm:$0xff]  ;;  %v300_v29 = vld [vmem:[#allocation2 + $0x80] sm:$0xff] }
  0x79   : > { %1541 = vmatprep.subr.bf16.mxu1 %v1540_v17  ;;  %v1352_v26 = vpack.c.bf16 %v305_v24, %v301_v23  ;;  %v307_v28 = vld [vmem:[#allocation2 + $0xb8] sm:$0xff]  ;;  %v304_v31 = vld [vmem:[#allocation2 + $0xa0] sm:$0xff]  ;;  %v302_v32 = vld [vmem:[#allocation2 + $0x90] sm:$0xff] }
  0x7a   : > { %v1544_v30 = vpack.c.bf16 %v307_v28, %v303_v27  ;;  %v306_v33 = vld [vmem:[#allocation2 + $0xb0] sm:$0xff]  ;;  %v1354_v34 = vpack.c.bf16 %v304_v31, %v300_v29  ;;  %v309_v35 = vld [vmem:[#allocation2 + $0xc8] sm:$0xff]  ;;  %v311_v37 = vld [vmem:[#allocation2 + $0xd8] sm:$0xff] }
  0x7b   : > { %1351 = vmatpush1.bf16.msra.mxu0 %v1350_v21  ;;  %v313_v36 = vld [vmem:[#allocation2 + $0xe8] sm:$0xff]  ;;  %v1546_v38 = vpack.c.bf16 %v306_v33, %v302_v32  ;;  %v315_v40 = vld [vmem:[#allocation2 + $0xf8] sm:$0xff]  ;;  %v308_v41 = vld [vmem:[#allocation2 + $0xc0] sm:$0xff] }
  0x7c   : > { %1543 = vmatpush1.bf16.msra.mxu1 %v1542_v25  ;;  %1353 = vmatprep.subr.bf16.mxu0 %v1352_v26  ;;  %v1356_v39 = vpack.c.bf16 %v313_v36, %v309_v35  ;;  %v312_v42 = vld [vmem:[#allocation2 + $0xe0] sm:$0xff]  ;;  %v1548_v43 = vpack.c.bf16 %v315_v40, %v311_v37  ;;  %v310_v44 = vld [vmem:[#allocation2 + $0xd0] sm:$0xff]  ;;  %v317_v46 = vld [vmem:[#allocation2 + $0x108] sm:$0xff] }
  0x7d   : > { %1545 = vmatprep.subr.bf16.mxu1 %v1544_v30  ;;  %v314_v45 = vld [vmem:[#allocation2 + $0xf0] sm:$0xff]  ;;  %v321_v47 = vld [vmem:[#allocation2 + $0x128] sm:$0xff]  ;;  %v319_v48 = vld [vmem:[#allocation2 + $0x118] sm:$0xff]  ;;  %v1358_v50 = vpack.c.bf16 %v312_v42, %v308_v41 }
  0x7e   : > { %v323_v49 = vld [vmem:[#allocation2 + $0x138] sm:$0xff]  ;;  %v1550_v51 = vpack.c.bf16 %v314_v45, %v310_v44  ;;  %v1360_v52 = vpack.c.bf16 %v321_v47, %v317_v46  ;;  %v316_v53 = vld [vmem:[#allocation2 + $0x100] sm:$0xff]  ;;  %v318_v55 = vld [vmem:[#allocation2 + $0x110] sm:$0xff] }
  0x7f   : > { %1355 = vmatpush1.bf16.msra.mxu0 %v1354_v34  ;;  %v320_v54 = vld [vmem:[#allocation2 + $0x120] sm:$0xff]  ;;  %v1552_v56 = vpack.c.bf16 %v323_v49, %v319_v48  ;;  %v322_v57 = vld [vmem:[#allocation2 + $0x130] sm:$0xff]  ;;  %v325_v58 = vld [vmem:[#allocation2 + $0x148] sm:$0xff] }
  0x80   : > { %1547 = vmatpush1.bf16.msra.mxu1 %v1546_v38  ;;  %1357 = vmatprep.subr.bf16.mxu0 %v1356_v39  ;;  %v329_v59 = vld [vmem:[#allocation2 + $0x168] sm:$0xff]  ;;  %v327_v60 = vld [vmem:[#allocation2 + $0x158] sm:$0xff]  ;;  %v1362_v62 = vpack.c.bf16 %v320_v54, %v316_v53  ;;  %v1554_v63 = vpack.c.bf16 %v322_v57, %v318_v55  ;;  %v324_v1 = vld [vmem:[#allocation2 + $0x140] sm:$0xff] }
  0x81   : > { %1549 = vmatprep.subr.bf16.mxu1 %v1548_v43  ;;  %v331_v61 = vld [vmem:[#allocation2 + $0x178] sm:$0xff]  ;;  %v1364_v0 = vpack.c.bf16 %v329_v59, %v325_v58  ;;  %v328_v2 = vld [vmem:[#allocation2 + $0x160] sm:$0xff]  ;;  %v326_v3 = vld [vmem:[#allocation2 + $0x150] sm:$0xff] }
  0x82   : > { %v1556_v4 = vpack.c.bf16 %v331_v61, %v327_v60  ;;  %v330_v5 = vld [vmem:[#allocation2 + $0x170] sm:$0xff]  ;;  %v333_v6 = vld [vmem:[#allocation2 + $0x188] sm:$0xff]  ;;  %v335_v8 = vld [vmem:[#allocation2 + $0x198] sm:$0xff]  ;;  %v1366_v10 = vpack.c.bf16 %v328_v2, %v324_v1 }
  0x83   : > { %1359 = vmatpush1.bf16.msra.mxu0 %v1358_v50  ;;  %v337_v7 = vld [vmem:[#allocation2 + $0x1a8] sm:$0xff]  ;;  %v339_v9 = vld [vmem:[#allocation2 + $0x1b8] sm:$0xff]  ;;  %v1558_v11 = vpack.c.bf16 %v330_v5, %v326_v3  ;;  %v332_v13 = vld [vmem:[#allocation2 + $0x180] sm:$0xff] }
  0x84   : > { %1551 = vmatpush1.bf16.msra.mxu1 %v1550_v51  ;;  %1361 = vmatprep.subr.bf16.mxu0 %v1360_v52  ;;  %v1368_v12 = vpack.c.bf16 %v337_v7, %v333_v6  ;;  %v336_v14 = vld [vmem:[#allocation2 + $0x1a0] sm:$0xff]  ;;  %v334_v15 = vld [vmem:[#allocation2 + $0x190] sm:$0xff]  ;;  %v1560_v16 = vpack.c.bf16 %v339_v9, %v335_v8  ;;  %v341_v18 = vld [vmem:[#allocation2 + $0x1c8] sm:$0xff] }
  0x85   : > { %1553 = vmatprep.subr.bf16.mxu1 %v1552_v56  ;;  %v338_v17 = vld [vmem:[#allocation2 + $0x1b0] sm:$0xff]  ;;  %v345_v19 = vld [vmem:[#allocation2 + $0x1e8] sm:$0xff]  ;;  %v343_v20 = vld [vmem:[#allocation2 + $0x1d8] sm:$0xff]  ;;  %v1370_v22 = vpack.c.bf16 %v336_v14, %v332_v13 }
  0x86   : > { %v347_v21 = vld [vmem:[#allocation2 + $0x1f8] sm:$0xff]  ;;  %v1562_v23 = vpack.c.bf16 %v338_v17, %v334_v15  ;;  %v1372_v24 = vpack.c.bf16 %v345_v19, %v341_v18  ;;  %v340_v25 = vld [vmem:[#allocation2 + $0x1c0] sm:$0xff]  ;;  %v342_v27 = vld [vmem:[#allocation2 + $0x1d0] sm:$0xff] }
  0x87   : > { %1363 = vmatpush1.bf16.msra.mxu0 %v1362_v62  ;;  %v344_v26 = vld [vmem:[#allocation2 + $0x1e0] sm:$0xff]  ;;  %v1564_v28 = vpack.c.bf16 %v347_v21, %v343_v20  ;;  %v346_v29 = vld [vmem:[#allocation2 + $0x1f0] sm:$0xff]  ;;  %v349_v30 = vld [vmem:[#allocation2 + $0x208] sm:$0xff] }
  0x88   : > { %1555 = vmatpush1.bf16.msra.mxu1 %v1554_v63  ;;  %1365 = vmatprep.subr.bf16.mxu0 %v1364_v0  ;;  %v353_v31 = vld [vmem:[#allocation2 + $0x228] sm:$0xff]  ;;  %v351_v32 = vld [vmem:[#allocation2 + $0x218] sm:$0xff]  ;;  %v1374_v34 = vpack.c.bf16 %v344_v26, %v340_v25  ;;  %v1566_v35 = vpack.c.bf16 %v346_v29, %v342_v27  ;;  %v348_v37 = vld [vmem:[#allocation2 + $0x200] sm:$0xff] }
  0x89   : > { %1557 = vmatprep.subr.bf16.mxu1 %v1556_v4  ;;  %v355_v33 = vld [vmem:[#allocation2 + $0x238] sm:$0xff]  ;;  %v1376_v36 = vpack.c.bf16 %v353_v31, %v349_v30  ;;  %v352_v38 = vld [vmem:[#allocation2 + $0x220] sm:$0xff]  ;;  %v350_v39 = vld [vmem:[#allocation2 + $0x210] sm:$0xff] }
  0x8a   : > { %v1568_v40 = vpack.c.bf16 %v355_v33, %v351_v32  ;;  %v354_v41 = vld [vmem:[#allocation2 + $0x230] sm:$0xff]  ;;  %v357_v42 = vld [vmem:[#allocation2 + $0x248] sm:$0xff]  ;;  %v359_v44 = vld [vmem:[#allocation2 + $0x258] sm:$0xff]  ;;  %v1378_v46 = vpack.c.bf16 %v352_v38, %v348_v37 }
  0x8b   : > { %1367 = vmatpush1.bf16.msra.mxu0 %v1366_v10  ;;  %v361_v43 = vld [vmem:[#allocation2 + $0x268] sm:$0xff]  ;;  %v363_v45 = vld [vmem:[#allocation2 + $0x278] sm:$0xff]  ;;  %v1570_v47 = vpack.c.bf16 %v354_v41, %v350_v39  ;;  %v356_v49 = vld [vmem:[#allocation2 + $0x240] sm:$0xff] }
  0x8c   : > { %1559 = vmatpush1.bf16.msra.mxu1 %v1558_v11  ;;  %1369 = vmatprep.subr.bf16.mxu0 %v1368_v12  ;;  %v1380_v48 = vpack.c.bf16 %v361_v43, %v357_v42  ;;  %v360_v50 = vld [vmem:[#allocation2 + $0x260] sm:$0xff]  ;;  %v358_v51 = vld [vmem:[#allocation2 + $0x250] sm:$0xff]  ;;  %v1572_v52 = vpack.c.bf16 %v363_v45, %v359_v44  ;;  %v365_v54 = vld [vmem:[#allocation2 + $0x288] sm:$0xff] }
  0x8d   : > { %1561 = vmatprep.subr.bf16.mxu1 %v1560_v16  ;;  %v362_v53 = vld [vmem:[#allocation2 + $0x270] sm:$0xff]  ;;  %v369_v55 = vld [vmem:[#allocation2 + $0x2a8] sm:$0xff]  ;;  %v367_v56 = vld [vmem:[#allocation2 + $0x298] sm:$0xff]  ;;  %v1382_v58 = vpack.c.bf16 %v360_v50, %v356_v49 }
  0x8e   : > { %v371_v57 = vld [vmem:[#allocation2 + $0x2b8] sm:$0xff]  ;;  %v1574_v59 = vpack.c.bf16 %v362_v53, %v358_v51  ;;  %v1384_v60 = vpack.c.bf16 %v369_v55, %v365_v54  ;;  %v364_v61 = vld [vmem:[#allocation2 + $0x280] sm:$0xff]  ;;  %v366_v63 = vld [vmem:[#allocation2 + $0x290] sm:$0xff] }
  0x8f   : > { %1371 = vmatpush1.bf16.msra.mxu0 %v1370_v22  ;;  %v368_v62 = vld [vmem:[#allocation2 + $0x2a0] sm:$0xff]  ;;  %v1576_v0 = vpack.c.bf16 %v371_v57, %v367_v56  ;;  %v370_v1 = vld [vmem:[#allocation2 + $0x2b0] sm:$0xff]  ;;  %v373_v2 = vld [vmem:[#allocation2 + $0x2c8] sm:$0xff] }
  0x90   : > { %1563 = vmatpush1.bf16.msra.mxu1 %v1562_v23  ;;  %1373 = vmatprep.subr.bf16.mxu0 %v1372_v24  ;;  %v377_v3 = vld [vmem:[#allocation2 + $0x2e8] sm:$0xff]  ;;  %v375_v4 = vld [vmem:[#allocation2 + $0x2d8] sm:$0xff]  ;;  %v1386_v6 = vpack.c.bf16 %v368_v62, %v364_v61  ;;  %v372_v7 = vld [vmem:[#allocation2 + $0x2c0] sm:$0xff]  ;;  %v1578_v8 = vpack.c.bf16 %v370_v1, %v366_v63 }
  0x91   : > { %1565 = vmatprep.subr.bf16.mxu1 %v1564_v28  ;;  %v379_v5 = vld [vmem:[#allocation2 + $0x2f8] sm:$0xff]  ;;  %v1388_v9 = vpack.c.bf16 %v377_v3, %v373_v2  ;;  %v376_v10 = vld [vmem:[#allocation2 + $0x2e0] sm:$0xff]  ;;  %v374_v11 = vld [vmem:[#allocation2 + $0x2d0] sm:$0xff] }
  0x92   : > { %v378_v12 = vld [vmem:[#allocation2 + $0x2f0] sm:$0xff]  ;;  %v1580_v13 = vpack.c.bf16 %v379_v5, %v375_v4  ;;  %v381_v14 = vld [vmem:[#allocation2 + $0x308] sm:$0xff]  ;;  %v383_v17 = vld [vmem:[#allocation2 + $0x318] sm:$0xff]  ;;  %v1390_v19 = vpack.c.bf16 %v376_v10, %v372_v7 }
  0x93   : > { %1375 = vmatpush1.bf16.msra.mxu0 %v1374_v34  ;;  %v385_v15 = vld [vmem:[#allocation2 + $0x328] sm:$0xff]  ;;  %v387_v18 = vld [vmem:[#allocation2 + $0x338] sm:$0xff]  ;;  %v1582_v20 = vpack.c.bf16 %v378_v12, %v374_v11  ;;  %v380_v22 = vld [vmem:[#allocation2 + $0x300] sm:$0xff] }
  0x94   : > { %1567 = vmatpush1.bf16.msra.mxu1 %v1566_v35  ;;  %1377 = vmatprep.subr.bf16.mxu0 %v1376_v36  ;;  %v279_v16 = vld [vmem:[%s2119_s10 + $0x8] sm:$0x3f]  ;;  %v1392_v21 = vpack.c.bf16 %v385_v15, %v381_v14  ;;  %v384_v23 = vld [vmem:[#allocation2 + $0x320] sm:$0xff]  ;;  %v382_v24 = vld [vmem:[#allocation2 + $0x310] sm:$0xff]  ;;  %v1584_v25 = vpack.c.bf16 %v387_v18, %v383_v17 }
  0x95   : > { %1569 = vmatprep.subr.bf16.mxu1 %v1568_v40  ;;  %754 = vmatprep.mubr.f32.mxu0 %v279_v16  ;;  %v386_v26 = vld [vmem:[#allocation2 + $0x330] sm:$0xff]  ;;  %v389_v27 = vld [vmem:[#allocation2 + $0x348] sm:$0xff]  ;;  %v391_v29 = vld [vmem:[#allocation2 + $0x358] sm:$0xff]  ;;  %v1394_v31 = vpack.c.bf16 %v384_v23, %v380_v22 }
  0x96   : > { %967 = vmatprep.mubr.f32.mxu1 %v279_v16  ;;  %v393_v28 = vld [vmem:[#allocation2 + $0x368] sm:$0xff]  ;;  %v395_v30 = vld [vmem:[#allocation2 + $0x378] sm:$0xff]  ;;  %v1586_v32 = vpack.c.bf16 %v386_v26, %v382_v24  ;;  %v388_v34 = vld [vmem:[#allocation2 + $0x340] sm:$0xff] }
  0x97   : > { %1379 = vmatpush1.bf16.msra.mxu0 %v1378_v46  ;;  %v1396_v33 = vpack.c.bf16 %v393_v28, %v389_v27  ;;  %v392_v35 = vld [vmem:[#allocation2 + $0x360] sm:$0xff]  ;;  %v390_v36 = vld [vmem:[#allocation2 + $0x350] sm:$0xff]  ;;  %v1588_v37 = vpack.c.bf16 %v395_v30, %v391_v29  ;;  %v397_v39 = vld [vmem:[#allocation2 + $0x388] sm:$0xff] }
  0x98   : > { %1571 = vmatpush1.bf16.msra.mxu1 %v1570_v47  ;;  %1381 = vmatprep.subr.bf16.mxu0 %v1380_v48  ;;  %v394_v38 = vld [vmem:[#allocation2 + $0x370] sm:$0xff]  ;;  %v401_v40 = vld [vmem:[#allocation2 + $0x3a8] sm:$0xff]  ;;  %v399_v41 = vld [vmem:[#allocation2 + $0x398] sm:$0xff]  ;;  %v1398_v43 = vpack.c.bf16 %v392_v35, %v388_v34 }
  0x99   : > { %1573 = vmatprep.subr.bf16.mxu1 %v1572_v52  ;;  %v403_v42 = vld [vmem:[#allocation2 + $0x3b8] sm:$0xff]  ;;  %v1590_v44 = vpack.c.bf16 %v394_v38, %v390_v36  ;;  %v1400_v45 = vpack.c.bf16 %v401_v40, %v397_v39  ;;  %v396_v46 = vld [vmem:[#allocation2 + $0x380] sm:$0xff]  ;;  %v398_v48 = vld [vmem:[#allocation2 + $0x390] sm:$0xff] }
  0x9a   : > { %v400_v47 = vld [vmem:[#allocation2 + $0x3a0] sm:$0xff]  ;;  %v1592_v49 = vpack.c.bf16 %v403_v42, %v399_v41  ;;  %v402_v50 = vld [vmem:[#allocation2 + $0x3b0] sm:$0xff]  ;;  %v405_v51 = vld [vmem:[#allocation2 + $0x3c8] sm:$0xff] }
  0x9b   : > { %1383 = vmatpush1.bf16.msra.mxu0 %v1382_v58  ;;  %v409_v52 = vld [vmem:[#allocation2 + $0x3e8] sm:$0xff]  ;;  %v407_v53 = vld [vmem:[#allocation2 + $0x3d8] sm:$0xff]  ;;  %v1402_v55 = vpack.c.bf16 %v400_v47, %v396_v46  ;;  %v1594_v56 = vpack.c.bf16 %v402_v50, %v398_v48  ;;  %v404_v58 = vld [vmem:[#allocation2 + $0x3c0] sm:$0xff] }
  0x9c   : > { %1575 = vmatpush1.bf16.msra.mxu1 %v1574_v59  ;;  %1385 = vmatprep.subr.bf16.mxu0 %v1384_v60  ;;  %v411_v54 = vld [vmem:[#allocation2 + $0x3f8] sm:$0xff]  ;;  %v1404_v57 = vpack.c.bf16 %v409_v52, %v405_v51  ;;  %v408_v59 = vld [vmem:[#allocation2 + $0x3e0] sm:$0xff]  ;;  %v406_v60 = vld [vmem:[#allocation2 + $0x3d0] sm:$0xff] }
  0x9d   : > { %1577 = vmatprep.subr.bf16.mxu1 %v1576_v0  ;;  %v1596_v61 = vpack.c.bf16 %v411_v54, %v407_v53  ;;  %v410_v62 = vld [vmem:[#allocation2 + $0x3f0] sm:$0xff]  ;;  %v413_v63 = vld [vmem:[#allocation2 + $0x408] sm:$0xff]  ;;  %v415_v1 = vld [vmem:[#allocation2 + $0x418] sm:$0xff]  ;;  %v1406_v3 = vpack.c.bf16 %v408_v59, %v404_v58 }
  0x9e   : > { %v417_v0 = vld [vmem:[#allocation2 + $0x428] sm:$0xff]  ;;  %v419_v2 = vld [vmem:[#allocation2 + $0x438] sm:$0xff]  ;;  %v1598_v4 = vpack.c.bf16 %v410_v62, %v406_v60  ;;  %v416_v7 = vld [vmem:[#allocation2 + $0x420] sm:$0xff] }
  0x9f   : > { %1387 = vmatpush1.bf16.msra.mxu0 %v1386_v6  ;;  %v1408_v5 = vpack.c.bf16 %v417_v0, %v413_v63  ;;  %v412_v6 = vld [vmem:[#allocation2 + $0x400] sm:$0xff]  ;;  %v418_v10 = vld [vmem:[#allocation2 + $0x430] sm:$0xff]  ;;  %v421_v11 = vld [vmem:[#allocation2 + $0x448] sm:$0xff] }
  0xa0   : > { %1579 = vmatpush1.bf16.msra.mxu1 %v1578_v8  ;;  %1389 = vmatprep.subr.bf16.mxu0 %v1388_v9  ;;  %v414_v8 = vld [vmem:[#allocation2 + $0x410] sm:$0xff]  ;;  %v1600_v9 = vpack.c.bf16 %v419_v2, %v415_v1  ;;  %v425_v12 = vld [vmem:[#allocation2 + $0x468] sm:$0xff]  ;;  %v427_v14 = vld [vmem:[#allocation2 + $0x478] sm:$0xff]  ;;  %v1410_v16 = vpack.c.bf16 %v416_v7, %v412_v6 }
  0xa1   : > { %1581 = vmatprep.subr.bf16.mxu1 %v1580_v13  ;;  %v423_v13 = vld [vmem:[#allocation2 + $0x458] sm:$0xff]  ;;  %v278_v15 = vld [vmem:[%s2119_s10] sm:$0x3f]  ;;  %v1602_v17 = vpack.c.bf16 %v418_v10, %v414_v8  ;;  %v1412_v18 = vpack.c.bf16 %v425_v12, %v421_v11  ;;  %v426_v23 = vld [vmem:[#allocation2 + $0x470] sm:$0xff] }
  0xa2   : > { %v1604_v22 = vpack.c.bf16 %v427_v14, %v423_v13  ;;  %v429_v24 = vld [vmem:[#allocation2 + $0x488] sm:$0xff]  ;;  %v431_v26 = vld [vmem:[#allocation2 + $0x498] sm:$0xff]  ;;  %v434_v35 = vld [vmem:[#allocation2 + $0x4b0] sm:$0xff] }
  0xa3   : > { %1391 = vmatpush1.bf16.msra.mxu0 %v1390_v19  ;;  %v420_v19 = vld [vmem:[#allocation2 + $0x440] sm:$0xff]  ;;  %v435_v27 = vld [vmem:[#allocation2 + $0x4b8] sm:$0xff]  ;;  %v437_v36 = vld [vmem:[#allocation2 + $0x4c8] sm:$0xff] }
  0xa4   : > { %1583 = vmatpush1.bf16.msra.mxu1 %v1582_v20  ;;  %1393 = vmatprep.subr.bf16.mxu0 %v1392_v21  ;;  %v424_v20 = vld [vmem:[#allocation2 + $0x460] sm:$0xff]  ;;  %v422_v21 = vld [vmem:[#allocation2 + $0x450] sm:$0xff]  ;;  %v1608_v34 = vpack.c.bf16 %v435_v27, %v431_v26  ;;  %v439_v38 = vld [vmem:[#allocation2 + $0x4d8] sm:$0xff] }
  0xa5   : > { %1585 = vmatprep.subr.bf16.mxu1 %v1584_v25  ;;  %v433_v25 = vld [vmem:[#allocation2 + $0x4a8] sm:$0xff]  ;;  %v1414_v28 = vpack.c.bf16 %v424_v20, %v420_v19  ;;  %v1606_v29 = vpack.c.bf16 %v426_v23, %v422_v21  ;;  %v443_v39 = vld [vmem:[#allocation2 + $0x4f8] sm:$0xff]  ;;  %v442_v47 = vld [vmem:[#allocation2 + $0x4f0] sm:$0xff] }
  0xa6   : > { %v1416_v30 = vpack.c.bf16 %v433_v25, %v429_v24  ;;  %v1612_v46 = vpack.c.bf16 %v443_v39, %v439_v38  ;;  %v445_v48 = vld [vmem:[#allocation2 + $0x508] sm:$0xff]  ;;  %v447_v50 = vld [vmem:[#allocation2 + $0x518] sm:$0xff]  ;;  %v450_v59 = vld [vmem:[#allocation2 + $0x530] sm:$0xff] }
  0xa7   : > { %1395 = vmatpush1.bf16.msra.mxu0 %v1394_v31  ;;  %v428_v31 = vld [vmem:[#allocation2 + $0x480] sm:$0xff]  ;;  %v451_v51 = vld [vmem:[#allocation2 + $0x538] sm:$0xff]  ;;  %v453_v60 = vld [vmem:[#allocation2 + $0x548] sm:$0xff] }
  0xa8   : > { %1587 = vmatpush1.bf16.msra.mxu1 %v1586_v32  ;;  %1397 = vmatprep.subr.bf16.mxu0 %v1396_v33  ;;  %v432_v32 = vld [vmem:[#allocation2 + $0x4a0] sm:$0xff]  ;;  %v430_v33 = vld [vmem:[#allocation2 + $0x490] sm:$0xff]  ;;  %v1616_v58 = vpack.c.bf16 %v451_v51, %v447_v50  ;;  %v455_v62 = vld [vmem:[#allocation2 + $0x558] sm:$0xff] }
  0xa9   : > { %1589 = vmatprep.subr.bf16.mxu1 %v1588_v37  ;;  %v441_v37 = vld [vmem:[#allocation2 + $0x4e8] sm:$0xff]  ;;  %v1418_v40 = vpack.c.bf16 %v432_v32, %v428_v31  ;;  %v1610_v41 = vpack.c.bf16 %v434_v35, %v430_v33  ;;  %v459_v63 = vld [vmem:[#allocation2 + $0x578] sm:$0xff]  ;;  %v458_v7 = vld [vmem:[#allocation2 + $0x570] sm:$0xff] }
  0xaa   : > { %v1420_v42 = vpack.c.bf16 %v441_v37, %v437_v36  ;;  %v1620_v6 = vpack.c.bf16 %v459_v63, %v455_v62  ;;  %v461_v8 = vld [vmem:[#allocation2 + $0x588] sm:$0xff]  ;;  %v463_v10 = vld [vmem:[#allocation2 + $0x598] sm:$0xff]  ;;  %v460_v13 = vld [vmem:[#allocation2 + $0x580] sm:$0xff] }
  0xab   : > { %1399 = vmatpush1.bf16.msra.mxu0 %v1398_v43  ;;  %v436_v43 = vld [vmem:[#allocation2 + $0x4c0] sm:$0xff]  ;;  %v467_v11 = vld [vmem:[#allocation2 + $0x5b8] sm:$0xff]  ;;  %v469_v20 = vld [vmem:[#allocation2 + $0x5c8] sm:$0xff] }
  0xac   : > { %1591 = vmatpush1.bf16.msra.mxu1 %v1590_v44  ;;  %1401 = vmatprep.subr.bf16.mxu0 %v1400_v45  ;;  %v440_v44 = vld [vmem:[#allocation2 + $0x4e0] sm:$0xff]  ;;  %v438_v45 = vld [vmem:[#allocation2 + $0x4d0] sm:$0xff]  ;;  %v1624_v19 = vpack.c.bf16 %v467_v11, %v463_v10  ;;  %v473_v21 = vld [vmem:[#allocation2 + $0x5e8] sm:$0xff] }
  0xad   : > { %1593 = vmatprep.subr.bf16.mxu1 %v1592_v49  ;;  %v449_v49 = vld [vmem:[#allocation2 + $0x528] sm:$0xff]  ;;  %v1422_v52 = vpack.c.bf16 %v440_v44, %v436_v43  ;;  %v1614_v53 = vpack.c.bf16 %v442_v47, %v438_v45  ;;  %v471_v23 = vld [vmem:[#allocation2 + $0x5d8] sm:$0xff]  ;;  %v1436_v27 = vpack.c.bf16 %v473_v21, %v469_v20  ;;  %v474_v32 = vld [vmem:[#allocation2 + $0x5f0] sm:$0xff] }
  0xae   : > { %v1424_v54 = vpack.c.bf16 %v449_v49, %v445_v48  ;;  %v475_v24 = vld [vmem:[#allocation2 + $0x5f8] sm:$0xff]  ;;  %v477_v33 = vld [vmem:[#allocation2 + $0x608] sm:$0xff]  ;;  %v482_v44 = vld [vmem:[#allocation2 + $0x630] sm:$0xff] }
  0xaf   : > { %1403 = vmatpush1.bf16.msra.mxu0 %v1402_v55  ;;  %v444_v55 = vld [vmem:[#allocation2 + $0x500] sm:$0xff]  ;;  %v1628_v31 = vpack.c.bf16 %v475_v24, %v471_v23  ;;  %v479_v35 = vld [vmem:[#allocation2 + $0x618] sm:$0xff]  ;;  %v485_v45 = vld [vmem:[#allocation2 + $0x648] sm:$0xff] }
  0xb0   : > { %1595 = vmatpush1.bf16.msra.mxu1 %v1594_v56  ;;  %1405 = vmatprep.subr.bf16.mxu0 %v1404_v57  ;;  %v448_v56 = vld [vmem:[#allocation2 + $0x520] sm:$0xff]  ;;  %v446_v57 = vld [vmem:[#allocation2 + $0x510] sm:$0xff]  ;;  %v483_v36 = vld [vmem:[#allocation2 + $0x638] sm:$0xff] }
  0xb1   : > { %1597 = vmatprep.subr.bf16.mxu1 %v1596_v61  ;;  %v457_v61 = vld [vmem:[#allocation2 + $0x568] sm:$0xff]  ;;  %v1426_v0 = vpack.c.bf16 %v448_v56, %v444_v55  ;;  %v1618_v1 = vpack.c.bf16 %v450_v59, %v446_v57  ;;  %v1632_v43 = vpack.c.bf16 %v483_v36, %v479_v35  ;;  %v487_v47 = vld [vmem:[#allocation2 + $0x658] sm:$0xff]  ;;  %v490_v56 = vld [vmem:[#allocation2 + $0x670] sm:$0xff] }
  0xb2   : > { %v1428_v2 = vpack.c.bf16 %v457_v61, %v453_v60  ;;  %v491_v48 = vld [vmem:[#allocation2 + $0x678] sm:$0xff]  ;;  %v493_v57 = vld [vmem:[#allocation2 + $0x688] sm:$0xff]  ;;  %v508_v24 = vld [vmem:[#allocation2 + $0x700] sm:$0xff] }
  0xb3   : > { %1407 = vmatpush1.bf16.msra.mxu0 %v1406_v3  ;;  %v452_v3 = vld [vmem:[#allocation2 + $0x540] sm:$0xff]  ;;  %v1636_v55 = vpack.c.bf16 %v491_v48, %v487_v47  ;;  %v495_v59 = vld [vmem:[#allocation2 + $0x698] sm:$0xff] }
  0xb4   : > { %1599 = vmatpush1.bf16.msra.mxu1 %v1598_v4  ;;  %1409 = vmatprep.subr.bf16.mxu0 %v1408_v5  ;;  %v456_v4 = vld [vmem:[#allocation2 + $0x560] sm:$0xff]  ;;  %v454_v5 = vld [vmem:[#allocation2 + $0x550] sm:$0xff]  ;;  %v499_v60 = vld [vmem:[#allocation2 + $0x6b8] sm:$0xff] }
  0xb5   : > { %1601 = vmatprep.subr.bf16.mxu1 %v1600_v9  ;;  %v465_v9 = vld [vmem:[#allocation2 + $0x5a8] sm:$0xff]  ;;  %v1430_v12 = vpack.c.bf16 %v456_v4, %v452_v3  ;;  %v1622_v14 = vpack.c.bf16 %v458_v7, %v454_v5  ;;  %v1640_v3 = vpack.c.bf16 %v499_v60, %v495_v59  ;;  %v498_v4 = vld [vmem:[#allocation2 + $0x6b0] sm:$0xff]  ;;  %v503_v7 = vld [vmem:[#allocation2 + $0x6d8] sm:$0xff] }
  0xb6   : > { %755 = vmatmul.mubr.f32.vlgmr.msra.gmra.mrb[0].mxu0 %v278_v15  ;;  %v501_v5 = vld [vmem:[#allocation2 + $0x6c8] sm:$0xff]  ;;  %v515_v20 = vld [vmem:[#allocation2 + $0x738] sm:$0xff]  ;;  %v516_v36 = vld [vmem:[#allocation2 + $0x740] sm:$0xff] }
  0xb7   : > { %1411 = vmatpush1.bf16.msra.mxu0 %v1410_v16  ;;  %968 = vmatmul.mubr.f32.vlgmr.msra.gmra.mrb[0].mxu1 %v278_v15  ;;  %v1432_v15 = vpack.c.bf16 %v465_v9, %v461_v8  ;;  %v464_v16 = vld [vmem:[#allocation2 + $0x5a0] sm:$0xff]  ;;  %v507_v8 = vld [vmem:[#allocation2 + $0x6f8] sm:$0xff] }
  0xb8   : > { %1603 = vmatpush1.bf16.msra.mxu1 %v1602_v17  ;;  %1413 = vmatprep.subr.bf16.mxu0 %v1412_v18  ;;  %v462_v17 = vld [vmem:[#allocation2 + $0x590] sm:$0xff]  ;;  %v1434_v25 = vpack.c.bf16 %v464_v16, %v460_v13  ;;  %v504_v13 = vld [vmem:[#allocation2 + $0x6e0] sm:$0xff] }
  0xb9   : > { %1605 = vmatprep.subr.bf16.mxu1 %v1604_v22  ;;  %v466_v18 = vld [vmem:[#allocation2 + $0x5b0] sm:$0xff]  ;;  %v281_v22 = vld [vmem:[%s2119_s10 + $0x18] sm:$0x3f]  ;;  %v524_v48 = vld [vmem:[#allocation2 + $0x780] sm:$0xff] }
  0xba   : > { %825 = vmatprep.mubr.f32.mxu0 %v281_v22  ;;  %1038 = vmatprep.mubr.f32.mxu1 %v281_v22  ;;  %v1626_v26 = vpack.c.bf16 %v466_v18, %v462_v17  ;;  %v506_v16 = vld [vmem:[#allocation2 + $0x6f0] sm:$0xff]  ;;  %v509_v17 = vld [vmem:[#allocation2 + $0x708] sm:$0xff]  ;;  %v532_v60 = vld [vmem:[#allocation2 + $0x7c0] sm:$0xff] }
  0xbb   : > { %1415 = vmatpush1.bf16.msra.mxu0 %v1414_v28  ;;  %v468_v28 = vld [vmem:[#allocation2 + $0x5c0] sm:$0xff]  ;;  %v513_v18 = vld [vmem:[#allocation2 + $0x728] sm:$0xff] }
  0xbc   : > { %1607 = vmatpush1.bf16.msra.mxu1 %v1606_v29  ;;  %1417 = vmatprep.subr.bf16.mxu0 %v1416_v30  ;;  %v472_v29 = vld [vmem:[#allocation2 + $0x5e0] sm:$0xff]  ;;  %v470_v30 = vld [vmem:[#allocation2 + $0x5d0] sm:$0xff]  ;;  %v1456_v23 = vpack.c.bf16 %v513_v18, %v509_v17 }
  0xbd   : > { %1609 = vmatprep.subr.bf16.mxu1 %v1608_v34  ;;  %v481_v34 = vld [vmem:[#allocation2 + $0x628] sm:$0xff]  ;;  %v1438_v37 = vpack.c.bf16 %v472_v29, %v468_v28  ;;  %v1630_v38 = vpack.c.bf16 %v474_v32, %v470_v30  ;;  %v514_v28 = vld [vmem:[#allocation2 + $0x730] sm:$0xff]  ;;  %v523_v32 = vld [vmem:[#allocation2 + $0x778] sm:$0xff] }
  0xbe   : > { %v1440_v39 = vpack.c.bf16 %v481_v34, %v477_v33  ;;  %v517_v29 = vld [vmem:[#allocation2 + $0x748] sm:$0xff]  ;;  %v280_v17 = vld [vmem:[%s2119_s10 + $0x10] sm:$0x3f] }
  0xbf   : > { %1419 = vmatpush1.bf16.msra.mxu0 %v1418_v40  ;;  %v476_v40 = vld [vmem:[#allocation2 + $0x600] sm:$0xff]  ;;  %v521_v30 = vld [vmem:[#allocation2 + $0x768] sm:$0xff] }
  0xc0   : > { %1611 = vmatpush1.bf16.msra.mxu1 %v1610_v41  ;;  %1421 = vmatprep.subr.bf16.mxu0 %v1420_v42  ;;  %v480_v41 = vld [vmem:[#allocation2 + $0x620] sm:$0xff]  ;;  %v478_v42 = vld [vmem:[#allocation2 + $0x610] sm:$0xff]  ;;  %v1460_v35 = vpack.c.bf16 %v521_v30, %v517_v29  ;;  %v563_v29 = vld [vmem:[#allocation2 + $0x8b8] sm:$0xff] }
  0xc1   : > { %1613 = vmatprep.subr.bf16.mxu1 %v1612_v46  ;;  %v489_v46 = vld [vmem:[#allocation2 + $0x668] sm:$0xff]  ;;  %v1442_v49 = vpack.c.bf16 %v480_v41, %v476_v40  ;;  %v1634_v50 = vpack.c.bf16 %v482_v44, %v478_v42  ;;  %v522_v40 = vld [vmem:[#allocation2 + $0x770] sm:$0xff]  ;;  %v531_v44 = vld [vmem:[#allocation2 + $0x7b8] sm:$0xff] }
  0xc2   : > { %v1444_v51 = vpack.c.bf16 %v489_v46, %v485_v45  ;;  %v525_v41 = vld [vmem:[#allocation2 + $0x788] sm:$0xff] }
  0xc3   : > { %1423 = vmatpush1.bf16.msra.mxu0 %v1422_v52  ;;  %v484_v52 = vld [vmem:[#allocation2 + $0x640] sm:$0xff]  ;;  %v529_v42 = vld [vmem:[#allocation2 + $0x7a8] sm:$0xff] }
  0xc4   : > { %1615 = vmatpush1.bf16.msra.mxu1 %v1614_v53  ;;  %1425 = vmatprep.subr.bf16.mxu0 %v1424_v54  ;;  %v488_v53 = vld [vmem:[#allocation2 + $0x660] sm:$0xff]  ;;  %v486_v54 = vld [vmem:[#allocation2 + $0x650] sm:$0xff]  ;;  %v1464_v47 = vpack.c.bf16 %v529_v42, %v525_v41  ;;  %v283_v30 = vld [vmem:[%s2119_s10 + $0x28] sm:$0x3f] }
  0xc5   : > { %1617 = vmatprep.subr.bf16.mxu1 %v1616_v58  ;;  %v497_v58 = vld [vmem:[#allocation2 + $0x6a8] sm:$0xff]  ;;  %v1446_v61 = vpack.c.bf16 %v488_v53, %v484_v52  ;;  %v1638_v62 = vpack.c.bf16 %v490_v56, %v486_v54  ;;  %v530_v52 = vld [vmem:[#allocation2 + $0x7b0] sm:$0xff]  ;;  %v539_v56 = vld [vmem:[#allocation2 + $0x7f8] sm:$0xff] }
  0xc6   : > { %v1448_v63 = vpack.c.bf16 %v497_v58, %v493_v57  ;;  %v533_v53 = vld [vmem:[#allocation2 + $0x7c8] sm:$0xff]  ;;  %v567_v41 = vld [vmem:[#allocation2 + $0x8d8] sm:$0xff] }
  0xc7   : > { %1427 = vmatpush1.bf16.msra.mxu0 %v1426_v0  ;;  %v492_v0 = vld [vmem:[#allocation2 + $0x680] sm:$0xff]  ;;  %v537_v54 = vld [vmem:[#allocation2 + $0x7e8] sm:$0xff]  ;;  %v571_v42 = vld [vmem:[#allocation2 + $0x8f8] sm:$0xff] }
  0xc8   : > { %1619 = vmatpush1.bf16.msra.mxu1 %v1618_v1  ;;  %1429 = vmatprep.subr.bf16.mxu0 %v1428_v2  ;;  %v496_v1 = vld [vmem:[#allocation2 + $0x6a0] sm:$0xff]  ;;  %v494_v2 = vld [vmem:[#allocation2 + $0x690] sm:$0xff]  ;;  %v1468_v59 = vpack.c.bf16 %v537_v54, %v533_v53  ;;  %v575_v53 = vld [vmem:[#allocation2 + $0x918] sm:$0xff] }
  0xc9   : > { %1621 = vmatprep.subr.bf16.mxu1 %v1620_v6  ;;  %v505_v6 = vld [vmem:[#allocation2 + $0x6e8] sm:$0xff]  ;;  %v1450_v9 = vpack.c.bf16 %v496_v1, %v492_v0  ;;  %v1642_v10 = vpack.c.bf16 %v498_v4, %v494_v2  ;;  %v538_v0 = vld [vmem:[#allocation2 + $0x7f0] sm:$0xff]  ;;  %v547_v4 = vld [vmem:[#allocation2 + $0x838] sm:$0xff] }
  0xca   : > { %v1452_v11 = vpack.c.bf16 %v505_v6, %v501_v5  ;;  %v541_v1 = vld [vmem:[#allocation2 + $0x808] sm:$0xff]  ;;  %v579_v54 = vld [vmem:[#allocation2 + $0x938] sm:$0xff] }
  0xcb   : > { %1431 = vmatpush1.bf16.msra.mxu0 %v1430_v12  ;;  %v500_v12 = vld [vmem:[#allocation2 + $0x6c0] sm:$0xff]  ;;  %v545_v2 = vld [vmem:[#allocation2 + $0x828] sm:$0xff] }
  0xcc   : > { %1623 = vmatpush1.bf16.msra.mxu1 %v1622_v14  ;;  %1433 = vmatprep.subr.bf16.mxu0 %v1432_v15  ;;  %v502_v14 = vld [vmem:[#allocation2 + $0x6d0] sm:$0xff]  ;;  %v1644_v15 = vpack.c.bf16 %v507_v8, %v503_v7  ;;  %v1454_v21 = vpack.c.bf16 %v504_v13, %v500_v12  ;;  %v1472_v7 = vpack.c.bf16 %v545_v2, %v541_v1  ;;  %v540_v8 = vld [vmem:[#allocation2 + $0x800] sm:$0xff]  ;;  %v549_v13 = vld [vmem:[#allocation2 + $0x848] sm:$0xff] }
  0xcd   : > { %1625 = vmatprep.subr.bf16.mxu1 %v1624_v19  ;;  %v511_v19 = vld [vmem:[#allocation2 + $0x718] sm:$0xff]  ;;  %v1646_v22 = vpack.c.bf16 %v506_v16, %v502_v14  ;;  %v546_v12 = vld [vmem:[#allocation2 + $0x830] sm:$0xff]  ;;  %v553_v14 = vld [vmem:[#allocation2 + $0x868] sm:$0xff] }
  0xce   : > { %v555_v16 = vld [vmem:[#allocation2 + $0x878] sm:$0xff] }
  0xcf   : > { %1435 = vmatpush1.bf16.msra.mxu0 %v1434_v25  ;;  %v512_v25 = vld [vmem:[#allocation2 + $0x720] sm:$0xff]  ;;  %v583_v1 = vld [vmem:[#allocation2 + $0x958] sm:$0xff] }
  0xd0   : > { %1627 = vmatpush1.bf16.msra.mxu1 %v1626_v26  ;;  %1437 = vmatprep.subr.bf16.mxu0 %v1436_v27  ;;  %v510_v26 = vld [vmem:[#allocation2 + $0x710] sm:$0xff]  ;;  %v1648_v27 = vpack.c.bf16 %v515_v20, %v511_v19  ;;  %v1458_v33 = vpack.c.bf16 %v512_v25, %v508_v24  ;;  %v1476_v20 = vpack.c.bf16 %v553_v14, %v549_v13  ;;  %v587_v2 = vld [vmem:[#allocation2 + $0x978] sm:$0xff] }
  0xd1   : > { %1629 = vmatprep.subr.bf16.mxu1 %v1628_v31  ;;  %v519_v31 = vld [vmem:[#allocation2 + $0x758] sm:$0xff]  ;;  %v1650_v34 = vpack.c.bf16 %v514_v28, %v510_v26  ;;  %v554_v25 = vld [vmem:[#allocation2 + $0x870] sm:$0xff]  ;;  %v557_v26 = vld [vmem:[#allocation2 + $0x888] sm:$0xff] }
  0xd2   : > { %v559_v28 = vld [vmem:[#allocation2 + $0x898] sm:$0xff] }
  0xd3   : > { %1439 = vmatpush1.bf16.msra.mxu0 %v1438_v37  ;;  %v520_v37 = vld [vmem:[#allocation2 + $0x760] sm:$0xff]  ;;  %v591_v13 = vld [vmem:[#allocation2 + $0x998] sm:$0xff] }
  0xd4   : > { %1631 = vmatpush1.bf16.msra.mxu1 %v1630_v38  ;;  %1441 = vmatprep.subr.bf16.mxu0 %v1440_v39  ;;  %v518_v38 = vld [vmem:[#allocation2 + $0x750] sm:$0xff]  ;;  %v1652_v39 = vpack.c.bf16 %v523_v32, %v519_v31  ;;  %v1462_v45 = vpack.c.bf16 %v520_v37, %v516_v36  ;;  %v1672_v37 = vpack.c.bf16 %v563_v29, %v559_v28  ;;  %v595_v14 = vld [vmem:[#allocation2 + $0x9b8] sm:$0xff] }
  0xd5   : > { %1633 = vmatprep.subr.bf16.mxu1 %v1632_v43  ;;  %v527_v43 = vld [vmem:[#allocation2 + $0x798] sm:$0xff]  ;;  %v1654_v46 = vpack.c.bf16 %v522_v40, %v518_v38  ;;  %v558_v36 = vld [vmem:[#allocation2 + $0x890] sm:$0xff]  ;;  %v569_v40 = vld [vmem:[#allocation2 + $0x8e8] sm:$0xff] }
  0xd6   : > { %v562_v38 = vld [vmem:[#allocation2 + $0x8b0] sm:$0xff] }
  0xd7   : > { %1443 = vmatpush1.bf16.msra.mxu0 %v1442_v49  ;;  %v528_v49 = vld [vmem:[#allocation2 + $0x7a0] sm:$0xff] }
  0xd8   : > { %1635 = vmatpush1.bf16.msra.mxu1 %v1634_v50  ;;  %1445 = vmatprep.subr.bf16.mxu0 %v1444_v51  ;;  %v526_v50 = vld [vmem:[#allocation2 + $0x790] sm:$0xff]  ;;  %v1656_v51 = vpack.c.bf16 %v531_v44, %v527_v43  ;;  %v1466_v57 = vpack.c.bf16 %v528_v49, %v524_v48  ;;  %v1674_v44 = vpack.c.bf16 %v562_v38, %v558_v36  ;;  %v609_v36 = vld [vmem:[#allocation2 + $0xa28] sm:$0xff]  ;;  %v611_v38 = vld [vmem:[#allocation2 + $0xa38] sm:$0xff] }
  0xd9   : > { %1637 = vmatprep.subr.bf16.mxu1 %v1636_v55  ;;  %v535_v55 = vld [vmem:[#allocation2 + $0x7d8] sm:$0xff]  ;;  %v1658_v58 = vpack.c.bf16 %v530_v52, %v526_v50  ;;  %v566_v48 = vld [vmem:[#allocation2 + $0x8d0] sm:$0xff]  ;;  %v1676_v49 = vpack.c.bf16 %v571_v42, %v567_v41  ;;  %v577_v52 = vld [vmem:[#allocation2 + $0x928] sm:$0xff] }
  0xda   : > { %v570_v50 = vld [vmem:[#allocation2 + $0x8f0] sm:$0xff]  ;;  %v604_v42 = vld [vmem:[#allocation2 + $0xa00] sm:$0xff] }
  0xdb   : > { %1447 = vmatpush1.bf16.msra.mxu0 %v1446_v61  ;;  %v536_v61 = vld [vmem:[#allocation2 + $0x7e0] sm:$0xff] }
  0xdc   : > { %1639 = vmatpush1.bf16.msra.mxu1 %v1638_v62  ;;  %1449 = vmatprep.subr.bf16.mxu0 %v1448_v63  ;;  %v534_v62 = vld [vmem:[#allocation2 + $0x7d0] sm:$0xff]  ;;  %v1660_v63 = vpack.c.bf16 %v539_v56, %v535_v55  ;;  %v1470_v5 = vpack.c.bf16 %v536_v61, %v532_v60  ;;  %v1678_v56 = vpack.c.bf16 %v570_v50, %v566_v48  ;;  %v617_v48 = vld [vmem:[#allocation2 + $0xa68] sm:$0xff]  ;;  %v619_v50 = vld [vmem:[#allocation2 + $0xa78] sm:$0xff] }
  0xdd   : > { %1641 = vmatprep.subr.bf16.mxu1 %v1640_v3  ;;  %v543_v3 = vld [vmem:[#allocation2 + $0x818] sm:$0xff]  ;;  %v1662_v6 = vpack.c.bf16 %v538_v0, %v534_v62  ;;  %v574_v60 = vld [vmem:[#allocation2 + $0x910] sm:$0xff]  ;;  %v1680_v61 = vpack.c.bf16 %v579_v54, %v575_v53  ;;  %v585_v0 = vld [vmem:[#allocation2 + $0x968] sm:$0xff] }
  0xde   : > { %v578_v62 = vld [vmem:[#allocation2 + $0x930] sm:$0xff]  ;;  %v612_v54 = vld [vmem:[#allocation2 + $0xa40] sm:$0xff] }
  0xdf   : > { %1451 = vmatpush1.bf16.msra.mxu0 %v1450_v9  ;;  %v544_v9 = vld [vmem:[#allocation2 + $0x820] sm:$0xff] }
  0xe0   : > { %1643 = vmatpush1.bf16.msra.mxu1 %v1642_v10  ;;  %1453 = vmatprep.subr.bf16.mxu0 %v1452_v11  ;;  %v542_v10 = vld [vmem:[#allocation2 + $0x810] sm:$0xff]  ;;  %v1664_v11 = vpack.c.bf16 %v547_v4, %v543_v3  ;;  %v1474_v18 = vpack.c.bf16 %v544_v9, %v540_v8  ;;  %v1682_v4 = vpack.c.bf16 %v578_v62, %v574_v60  ;;  %v625_v60 = vld [vmem:[#allocation2 + $0xaa8] sm:$0xff]  ;;  %v627_v62 = vld [vmem:[#allocation2 + $0xab8] sm:$0xff] }
  0xe1   : > { %1645 = vmatprep.subr.bf16.mxu1 %v1644_v15  ;;  %v551_v15 = vld [vmem:[#allocation2 + $0x858] sm:$0xff]  ;;  %v1666_v19 = vpack.c.bf16 %v546_v12, %v542_v10  ;;  %v582_v8 = vld [vmem:[#allocation2 + $0x950] sm:$0xff]  ;;  %v1684_v9 = vpack.c.bf16 %v587_v2, %v583_v1  ;;  %v593_v12 = vld [vmem:[#allocation2 + $0x9a8] sm:$0xff] }
  0xe2   : > { %v1668_v24 = vpack.c.bf16 %v555_v16, %v551_v15  ;;  %v586_v10 = vld [vmem:[#allocation2 + $0x970] sm:$0xff]  ;;  %v620_v2 = vld [vmem:[#allocation2 + $0xa80] sm:$0xff] }
  0xe3   : > { %1455 = vmatpush1.bf16.msra.mxu0 %v1454_v21  ;;  %v548_v21 = vld [vmem:[#allocation2 + $0x840] sm:$0xff]  ;;  %v1686_v16 = vpack.c.bf16 %v586_v10, %v582_v8  ;;  %v633_v8 = vld [vmem:[#allocation2 + $0xae8] sm:$0xff]  ;;  %v635_v10 = vld [vmem:[#allocation2 + $0xaf8] sm:$0xff] }
  0xe4   : > { %1647 = vmatpush1.bf16.msra.mxu1 %v1646_v22  ;;  %1457 = vmatprep.subr.bf16.mxu0 %v1456_v23  ;;  %v552_v22 = vld [vmem:[#allocation2 + $0x860] sm:$0xff]  ;;  %v550_v23 = vld [vmem:[#allocation2 + $0x850] sm:$0xff] }
  0xe5   : > { %1649 = vmatprep.subr.bf16.mxu1 %v1648_v27  ;;  %v561_v27 = vld [vmem:[#allocation2 + $0x8a8] sm:$0xff]  ;;  %v1478_v31 = vpack.c.bf16 %v552_v22, %v548_v21  ;;  %v1670_v32 = vpack.c.bf16 %v554_v25, %v550_v23  ;;  %v1688_v21 = vpack.c.bf16 %v595_v14, %v591_v13  ;;  %v594_v22 = vld [vmem:[#allocation2 + $0x9b0] sm:$0xff]  ;;  %v599_v25 = vld [vmem:[#allocation2 + $0x9d8] sm:$0xff] }
  0xe6   : > { %v597_v23 = vld [vmem:[#allocation2 + $0x9c8] sm:$0xff]  ;;  %v628_v14 = vld [vmem:[#allocation2 + $0xac0] sm:$0xff] }
  0xe7   : > { %1459 = vmatpush1.bf16.msra.mxu0 %v1458_v33  ;;  %v1480_v33 = vpack.c.bf16 %v561_v27, %v557_v26  ;;  %v603_v26 = vld [vmem:[#allocation2 + $0x9f8] sm:$0xff] }
  0xe8   : > { %1651 = vmatpush1.bf16.msra.mxu1 %v1650_v34  ;;  %1461 = vmatprep.subr.bf16.mxu0 %v1460_v35  ;;  %v556_v34 = vld [vmem:[#allocation2 + $0x880] sm:$0xff] }
  0xe9   : > { %1653 = vmatprep.subr.bf16.mxu1 %v1652_v39  ;;  %v560_v35 = vld [vmem:[#allocation2 + $0x8a0] sm:$0xff]  ;;  %v565_v39 = vld [vmem:[#allocation2 + $0x8c8] sm:$0xff] }
  0xea   : > { %v1482_v43 = vpack.c.bf16 %v560_v35, %v556_v34  ;;  %v602_v34 = vld [vmem:[#allocation2 + $0x9f0] sm:$0xff]  ;;  %v605_v35 = vld [vmem:[#allocation2 + $0xa08] sm:$0xff] }
  0xeb   : > { %1463 = vmatpush1.bf16.msra.mxu0 %v1462_v45  ;;  %v1484_v45 = vpack.c.bf16 %v569_v40, %v565_v39  ;;  %v1504_v41 = vpack.c.bf16 %v609_v36, %v605_v35 }
  0xec   : > { %1655 = vmatpush1.bf16.msra.mxu1 %v1654_v46  ;;  %1465 = vmatprep.subr.bf16.mxu0 %v1464_v47  ;;  %v564_v46 = vld [vmem:[#allocation2 + $0x8c0] sm:$0xff] }
  0xed   : > { %1657 = vmatprep.subr.bf16.mxu1 %v1656_v51  ;;  %v568_v47 = vld [vmem:[#allocation2 + $0x8e0] sm:$0xff]  ;;  %v573_v51 = vld [vmem:[#allocation2 + $0x908] sm:$0xff] }
  0xee   : > { %v1486_v55 = vpack.c.bf16 %v568_v47, %v564_v46  ;;  %v610_v46 = vld [vmem:[#allocation2 + $0xa30] sm:$0xff]  ;;  %v613_v47 = vld [vmem:[#allocation2 + $0xa48] sm:$0xff] }
  0xef   : > { %1467 = vmatpush1.bf16.msra.mxu0 %v1466_v57  ;;  %v1488_v57 = vpack.c.bf16 %v577_v52, %v573_v51  ;;  %v1508_v53 = vpack.c.bf16 %v617_v48, %v613_v47 }
  0xf0   : > { %1659 = vmatpush1.bf16.msra.mxu1 %v1658_v58  ;;  %1469 = vmatprep.subr.bf16.mxu0 %v1468_v59  ;;  %v572_v58 = vld [vmem:[#allocation2 + $0x900] sm:$0xff] }
  0xf1   : > { %1661 = vmatprep.subr.bf16.mxu1 %v1660_v63  ;;  %v576_v59 = vld [vmem:[#allocation2 + $0x920] sm:$0xff]  ;;  %v581_v63 = vld [vmem:[#allocation2 + $0x948] sm:$0xff] }
  0xf2   : > { %v1490_v3 = vpack.c.bf16 %v576_v59, %v572_v58  ;;  %v618_v58 = vld [vmem:[#allocation2 + $0xa70] sm:$0xff]  ;;  %v621_v59 = vld [vmem:[#allocation2 + $0xa88] sm:$0xff] }
  0xf3   : > { %1471 = vmatpush1.bf16.msra.mxu0 %v1470_v5  ;;  %v1492_v5 = vpack.c.bf16 %v585_v0, %v581_v63  ;;  %v1512_v1 = vpack.c.bf16 %v625_v60, %v621_v59 }
  0xf4   : > { %1663 = vmatpush1.bf16.msra.mxu1 %v1662_v6  ;;  %1473 = vmatprep.subr.bf16.mxu0 %v1472_v7  ;;  %v580_v6 = vld [vmem:[#allocation2 + $0x940] sm:$0xff] }
  0xf5   : > { %1665 = vmatprep.subr.bf16.mxu1 %v1664_v11  ;;  %v584_v7 = vld [vmem:[#allocation2 + $0x960] sm:$0xff]  ;;  %v589_v11 = vld [vmem:[#allocation2 + $0x988] sm:$0xff] }
  0xf6   : > { %826 = vmatmul.mubr.f32.vlgmr.msra.gmra.mrb[0].mxu0 %v280_v17  ;;  %v1494_v15 = vpack.c.bf16 %v584_v7, %v580_v6  ;;  %v626_v6 = vld [vmem:[#allocation2 + $0xab0] sm:$0xff]  ;;  %v629_v7 = vld [vmem:[#allocation2 + $0xac8] sm:$0xff] }
  0xf7   : > { %1475 = vmatpush1.bf16.msra.mxu0 %v1474_v18  ;;  %1039 = vmatmul.mubr.f32.vlgmr.msra.gmra.mrb[0].mxu1 %v280_v17  ;;  %v1496_v17 = vpack.c.bf16 %v593_v12, %v589_v11  ;;  %v588_v18 = vld [vmem:[#allocation2 + $0x980] sm:$0xff]  ;;  %v1516_v13 = vpack.c.bf16 %v633_v8, %v629_v7 }
  0xf8   : > { %1667 = vmatpush1.bf16.msra.mxu1 %v1666_v19  ;;  %1477 = vmatprep.subr.bf16.mxu0 %v1476_v20  ;;  %v592_v19 = vld [vmem:[#allocation2 + $0x9a0] sm:$0xff]  ;;  %v590_v20 = vld [vmem:[#allocation2 + $0x990] sm:$0xff] }
  0xf9   : > { %1669 = vmatprep.subr.bf16.mxu1 %v1668_v24  ;;  %896 = vmatprep.mubr.f32.mxu0 %v283_v30  ;;  %v601_v24 = vld [vmem:[#allocation2 + $0x9e8] sm:$0xff]  ;;  %v1498_v27 = vpack.c.bf16 %v592_v19, %v588_v18  ;;  %v1690_v28 = vpack.c.bf16 %v594_v22, %v590_v20  ;;  %v634_v18 = vld [vmem:[#allocation2 + $0xaf0] sm:$0xff]  ;;  %v643_v22 = vld [vmem:[#allocation2 + $0xb38] sm:$0xff] }
  0xfa   : > { %1109 = vmatprep.mubr.f32.mxu1 %v283_v30  ;;  %v1500_v29 = vpack.c.bf16 %v601_v24, %v597_v23  ;;  %v596_v30 = vld [vmem:[#allocation2 + $0x9c0] sm:$0xff]  ;;  %v637_v19 = vld [vmem:[#allocation2 + $0xb08] sm:$0xff] }
  0xfb   : > { %1479 = vmatpush1.bf16.msra.mxu0 %v1478_v31  ;;  %v600_v31 = vld [vmem:[#allocation2 + $0x9e0] sm:$0xff]  ;;  %v641_v20 = vld [vmem:[#allocation2 + $0xb28] sm:$0xff] }
  0xfc   : > { %1671 = vmatpush1.bf16.msra.mxu1 %v1670_v32  ;;  %1481 = vmatprep.subr.bf16.mxu0 %v1480_v33  ;;  %v598_v32 = vld [vmem:[#allocation2 + $0x9d0] sm:$0xff]  ;;  %v1692_v33 = vpack.c.bf16 %v603_v26, %v599_v25  ;;  %v1502_v39 = vpack.c.bf16 %v600_v31, %v596_v30  ;;  %v1520_v25 = vpack.c.bf16 %v641_v20, %v637_v19  ;;  %v636_v26 = vld [vmem:[#allocation2 + $0xb00] sm:$0xff]  ;;  %v645_v31 = vld [vmem:[#allocation2 + $0xb48] sm:$0xff] }
  0xfd   : > { %1673 = vmatprep.subr.bf16.mxu1 %v1672_v37  ;;  %v607_v37 = vld [vmem:[#allocation2 + $0xa18] sm:$0xff]  ;;  %v1694_v40 = vpack.c.bf16 %v602_v34, %v598_v32  ;;  %v642_v30 = vld [vmem:[#allocation2 + $0xb30] sm:$0xff]  ;;  %v649_v32 = vld [vmem:[#allocation2 + $0xb68] sm:$0xff] }
  0xfe   : > { %v651_v34 = vld [vmem:[#allocation2 + $0xb78] sm:$0xff] }
  0xff   : > { %1483 = vmatpush1.bf16.msra.mxu0 %v1482_v43  ;;  %v608_v43 = vld [vmem:[#allocation2 + $0xa20] sm:$0xff] }
 0x100   : > { %1675 = vmatpush1.bf16.msra.mxu1 %v1674_v44  ;;  %1485 = vmatprep.subr.bf16.mxu0 %v1484_v45  ;;  %v606_v44 = vld [vmem:[#allocation2 + $0xa10] sm:$0xff]  ;;  %v1696_v45 = vpack.c.bf16 %v611_v38, %v607_v37  ;;  %v1506_v51 = vpack.c.bf16 %v608_v43, %v604_v42  ;;  %v1524_v37 = vpack.c.bf16 %v649_v32, %v645_v31  ;;  %v644_v38 = vld [vmem:[#allocation2 + $0xb40] sm:$0xff]  ;;  %v653_v43 = vld [vmem:[#allocation2 + $0xb88] sm:$0xff] }
 0x101   : > { %1677 = vmatprep.subr.bf16.mxu1 %v1676_v49  ;;  %v615_v49 = vld [vmem:[#allocation2 + $0xa58] sm:$0xff]  ;;  %v1698_v52 = vpack.c.bf16 %v610_v46, %v606_v44  ;;  %v650_v42 = vld [vmem:[#allocation2 + $0xb70] sm:$0xff]  ;;  %v657_v44 = vld [vmem:[#allocation2 + $0xba8] sm:$0xff] }
 0x102   : > { %v659_v46 = vld [vmem:[#allocation2 + $0xbb8] sm:$0xff] }
 0x103   : > { %1487 = vmatpush1.bf16.msra.mxu0 %v1486_v55  ;;  %v616_v55 = vld [vmem:[#allocation2 + $0xa60] sm:$0xff] }
 0x104   : > { %1679 = vmatpush1.bf16.msra.mxu1 %v1678_v56  ;;  %1489 = vmatprep.subr.bf16.mxu0 %v1488_v57  ;;  %v614_v56 = vld [vmem:[#allocation2 + $0xa50] sm:$0xff]  ;;  %v1700_v57 = vpack.c.bf16 %v619_v50, %v615_v49  ;;  %v1510_v63 = vpack.c.bf16 %v616_v55, %v612_v54  ;;  %v1528_v49 = vpack.c.bf16 %v657_v44, %v653_v43  ;;  %v652_v50 = vld [vmem:[#allocation2 + $0xb80] sm:$0xff]  ;;  %v661_v55 = vld [vmem:[#allocation2 + $0xbc8] sm:$0xff] }
 0x105   : > { %1681 = vmatprep.subr.bf16.mxu1 %v1680_v61  ;;  %v623_v61 = vld [vmem:[#allocation2 + $0xa98] sm:$0xff]  ;;  %v1702_v0 = vpack.c.bf16 %v618_v58, %v614_v56  ;;  %v658_v54 = vld [vmem:[#allocation2 + $0xbb0] sm:$0xff]  ;;  %v665_v56 = vld [vmem:[#allocation2 + $0xbe8] sm:$0xff] }
 0x106   : > { %v667_v58 = vld [vmem:[#allocation2 + $0xbf8] sm:$0xff] }
 0x107   : > { %1491 = vmatpush1.bf16.msra.mxu0 %v1490_v3  ;;  %v624_v3 = vld [vmem:[#allocation2 + $0xaa0] sm:$0xff] }
 0x108   : > { %1683 = vmatpush1.bf16.msra.mxu1 %v1682_v4  ;;  %1493 = vmatprep.subr.bf16.mxu0 %v1492_v5  ;;  %v622_v4 = vld [vmem:[#allocation2 + $0xa90] sm:$0xff]  ;;  %v1704_v5 = vpack.c.bf16 %v627_v62, %v623_v61  ;;  %v1514_v11 = vpack.c.bf16 %v624_v3, %v620_v2  ;;  %v1532_v61 = vpack.c.bf16 %v665_v56, %v661_v55  ;;  %v660_v62 = vld [vmem:[#allocation2 + $0xbc0] sm:$0xff] }
 0x109   : > { %1685 = vmatprep.subr.bf16.mxu1 %v1684_v9  ;;  %v631_v9 = vld [vmem:[#allocation2 + $0xad8] sm:$0xff]  ;;  %v1706_v12 = vpack.c.bf16 %v626_v6, %v622_v4  ;;  %v666_v2 = vld [vmem:[#allocation2 + $0xbf0] sm:$0xff]  ;;  %v670_v6 = vlaneseq }
 0x10b   : > { %1495 = vmatpush1.bf16.msra.mxu0 %v1494_v15  ;;  %v632_v15 = vld [vmem:[#allocation2 + $0xae0] sm:$0xff]  ;;  %v671_v7 = vshrl.u32 %v670_v6, 7 }
 0x10c   : > { %1687 = vmatpush1.bf16.msra.mxu1 %v1686_v16  ;;  %1497 = vmatprep.subr.bf16.mxu0 %v1496_v17  ;;  %v630_v16 = vld [vmem:[#allocation2 + $0xad0] sm:$0xff]  ;;  %v1708_v17 = vpack.c.bf16 %v635_v10, %v631_v9  ;;  %v1518_v23 = vpack.c.bf16 %v632_v15, %v628_v14  ;;  %v668_v9 = vld [vmem:[#allocation4] sm:$0xf] }
 0x10d   : > { %1689 = vmatprep.subr.bf16.mxu1 %v1688_v21  ;;  %v639_v21 = vld [vmem:[#allocation2 + $0xb18] sm:$0xff]  ;;  %v1710_v24 = vpack.c.bf16 %v634_v18, %v630_v16  ;;  %v2127_v8 = vsub.s32 0, %v671_v7  ;;  %v2129_v10 = vsub.s32 2, %v671_v7 }
 0x10f   : > { %1499 = vmatpush1.bf16.msra.mxu0 %v1498_v27  ;;  %v640_v27 = vld [vmem:[#allocation2 + $0xb20] sm:$0xff]  ;;  %v681_v14 = vrot.slane %v668_v9, %v2129_v10 }
 0x110   : > { %1691 = vmatpush1.bf16.msra.mxu1 %v1690_v28  ;;  %1501 = vmatprep.subr.bf16.mxu0 %v1500_v29  ;;  %v638_v28 = vld [vmem:[#allocation2 + $0xb10] sm:$0xff]  ;;  %v1712_v29 = vpack.c.bf16 %v643_v22, %v639_v21  ;;  %v1522_v35 = vpack.c.bf16 %v640_v27, %v636_v26 }
 0x111   : > { %1693 = vmatprep.subr.bf16.mxu1 %v1692_v33  ;;  %v647_v33 = vld [vmem:[#allocation2 + $0xb58] sm:$0xff]  ;;  %v1714_v36 = vpack.c.bf16 %v642_v30, %v638_v28 }
 0x113   : > { %1503 = vmatpush1.bf16.msra.mxu0 %v1502_v39  ;;  %v648_v39 = vld [vmem:[#allocation2 + $0xb60] sm:$0xff] }
 0x114   : > { %1695 = vmatpush1.bf16.msra.mxu1 %v1694_v40  ;;  %1505 = vmatprep.subr.bf16.mxu0 %v1504_v41  ;;  %v646_v40 = vld [vmem:[#allocation2 + $0xb50] sm:$0xff]  ;;  %v1716_v41 = vpack.c.bf16 %v651_v34, %v647_v33  ;;  %v1526_v47 = vpack.c.bf16 %v648_v39, %v644_v38 }
 0x115   : > { %1697 = vmatprep.subr.bf16.mxu1 %v1696_v45  ;;  %v655_v45 = vld [vmem:[#allocation2 + $0xb98] sm:$0xff]  ;;  %v1718_v48 = vpack.c.bf16 %v650_v42, %v646_v40 }
 0x117   : > { %1507 = vmatpush1.bf16.msra.mxu0 %v1506_v51  ;;  %v656_v51 = vld [vmem:[#allocation2 + $0xba0] sm:$0xff] }
 0x118   : > { %1699 = vmatpush1.bf16.msra.mxu1 %v1698_v52  ;;  %1509 = vmatprep.subr.bf16.mxu0 %v1508_v53  ;;  %v654_v52 = vld [vmem:[#allocation2 + $0xb90] sm:$0xff]  ;;  %v1720_v53 = vpack.c.bf16 %v659_v46, %v655_v45  ;;  %v1530_v59 = vpack.c.bf16 %v656_v51, %v652_v50  ;;  %v1153_v50 = vld [vmem:[#allocation6] sm:$0xf]  ;;  %v1179_v51 = vld [vmem:[#allocation7] sm:$0xf] }
 0x119   : > { %1701 = vmatprep.subr.bf16.mxu1 %v1700_v57  ;;  %v663_v57 = vld [vmem:[#allocation2 + $0xbd8] sm:$0xff]  ;;  %v1722_v60 = vpack.c.bf16 %v658_v54, %v654_v52  ;;  %v1158_v52 = vrot.slane %v1153_v50, %v2127_v8 }
 0x11b   : > { %1511 = vmatpush1.bf16.msra.mxu0 %v1510_v63  ;;  %v664_v63 = vld [vmem:[#allocation2 + $0xbe0] sm:$0xff] }
 0x11c   : > { %1703 = vmatpush1.bf16.msra.mxu1 %v1702_v0  ;;  %1513 = vmatprep.subr.bf16.mxu0 %v1512_v1  ;;  %v1724_v0 = vpack.c.bf16 %v667_v58, %v663_v57  ;;  %v662_v1 = vld [vmem:[#allocation2 + $0xbd0] sm:$0xff]  ;;  %v1534_v3 = vpack.c.bf16 %v664_v63, %v660_v62  ;;  %v1192_v62 = vrot.slane %v1179_v51, %v2129_v10 }
 0x11d   : > { %1705 = vmatprep.subr.bf16.mxu1 %v1704_v5  ;;  %v1726_v4 = vpack.c.bf16 %v666_v2, %v662_v1  ;;  %v282_v5 = vld [vmem:[%s2119_s10 + $0x20] sm:$0x3f] }
 0x11f   : > { %1515 = vmatpush1.bf16.msra.mxu0 %v1514_v11  ;;  %v2131_v11 = vsub.s32 1, %v671_v7 }
 0x120   : > { %1707 = vmatpush1.bf16.msra.mxu1 %v1706_v12  ;;  %1517 = vmatprep.subr.bf16.mxu0 %v1516_v13  ;;  %v2133_v12 = vsub.s32 3, %v671_v7  ;;  %v673_v13 = vrot.slane %v668_v9, %v2127_v8 }
 0x121   : > { %1709 = vmatprep.subr.bf16.mxu1 %v1708_v17  ;;  %v677_v15 = vrot.slane %v668_v9, %v2131_v11  ;;  %v1162_v54 = vrot.slane %v1153_v50, %v2131_v11  ;;  %v1188_v63 = vrot.slane %v1179_v51, %v2131_v11 }
 0x122   : > { %v685_v17 = vrot.slane %v668_v9, %v2133_v12  ;;  %v1170_v55 = vrot.slane %v1153_v50, %v2133_v12 }
 0x123   : > { %1519 = vmatpush1.bf16.msra.mxu0 %v1518_v23 }
 0x124   : > { %1711 = vmatpush1.bf16.msra.mxu1 %v1710_v24  ;;  %1521 = vmatprep.subr.bf16.mxu0 %v1520_v25 }
 0x125   : > { %1713 = vmatprep.subr.bf16.mxu1 %v1712_v29 }
 0x127   : > { %1523 = vmatpush1.bf16.msra.mxu0 %v1522_v35 }
 0x128   : > { %1715 = vmatpush1.bf16.msra.mxu1 %v1714_v36  ;;  %1525 = vmatprep.subr.bf16.mxu0 %v1524_v37 }
 0x129   : > { %1717 = vmatprep.subr.bf16.mxu1 %v1716_v41 }
 0x12b   : > { %1527 = vmatpush1.bf16.msra.mxu0 %v1526_v47 }
 0x12c   : > { %1719 = vmatpush1.bf16.msra.mxu1 %v1718_v48  ;;  %1529 = vmatprep.subr.bf16.mxu0 %v1528_v49 }
 0x12d   : > { %1721 = vmatprep.subr.bf16.mxu1 %v1720_v53  ;;  %v1166_v53 = vrot.slane %v1153_v50, %v2129_v10 }
 0x12f   : > { %1531 = vmatpush1.bf16.msra.mxu0 %v1530_v59 }
 0x130   : > { %1723 = vmatpush1.bf16.msra.mxu1 %v1722_v60  ;;  %1533 = vmatprep.subr.bf16.mxu0 %v1532_v61  ;;  %v1184_v61 = vrot.slane %v1179_v51, %v2127_v8 }
 0x131   : > { %1725 = vmatprep.subr.bf16.mxu1 %v1724_v0  ;;  %v1196_v0 = vrot.slane %v1179_v51, %v2133_v12 }
 0x133   : > { %1535 = vmatpush1.bf16.msra.mxu0 %v1534_v3 }
 0x134   : > { %1727 = vmatpush1.bf16.msra.mxu1 %v1726_v4 }
 0x136   : > { %897 = vmatmul.mubr.f32.vlgmr.msra.gmra.mrb[0].mxu0 %v282_v5 }
 0x137   : > { %1110 = vmatmul.mubr.f32.vlgmr.msra.gmra.mrb[0].mxu1 %v282_v5 }
 0x209   : > { %v898_v16 = vpop.f32.mrb[0].mxu0 }
 0x20a   : > { %v1728_v18 = vadd.f32 %v898_v16, %v673_v13  ;;  %v1111_v19 = vpop.f32.mrb[0].mxu1  ;;  %v900_v20 = vpop.f32.mrb[1].mxu0 }
 0x20b   : > { %v1730_v21 = vadd.f32 %v1111_v19, %v681_v14  ;;  %v1729_v22 = vadd.f32 %v900_v20, %v677_v15  ;;  %v1113_v23 = vpop.f32.mrb[1].mxu1 }
 0x20c   : > { %v1127_v24 = vmul.f32 %v1728_v18, %v1728_v18  ;;  %v1117_v25 = vsel %vm1116_vm0, %v1728_v18, 0.0  ;;  %v1731_v28 = vadd.f32 %v1113_v23, %v685_v17 }
 0x20d   : > { %v1129_v26 = vmul.f32 %v1730_v21, %v1730_v21  ;;  %v1128_v27 = vmul.f32 %v1729_v22, %v1729_v22  ;;  %v1118_v29 = vsel %vm1116_vm0, %v1729_v22, 0.0  ;;  %v1120_v32 = vsel %vm1116_vm0, %v1730_v21, 0.0 }
 0x20e   : > { %v1119_v30 = vadd.f32 %v1118_v29, %v1117_v25  ;;  %v1131_v31 = vsel %vm1116_vm0, %v1127_v24, 0.0  ;;  %v1122_v36 = vsel %vm1116_vm0, %v1731_v28, 0.0  ;;  %v1130_v37 = vmul.f32 %v1731_v28, %v1731_v28 }
 0x20f   : > { %v1132_v33 = vsel %vm1116_vm0, %v1128_v27, 0.0  ;;  %v1134_v38 = vsel %vm1116_vm0, %v1129_v26, 0.0 }
 0x210   : > { %v1121_v34 = vadd.f32 %v1120_v32, %v1119_v30  ;;  %v1133_v35 = vadd.f32 %v1132_v33, %v1131_v31  ;;  %v1136_v41 = vsel %vm1116_vm0, %v1130_v37, 0.0 }
 0x212   : > { %v1123_v39 = vadd.f32 %v1122_v36, %v1121_v34  ;;  %v1135_v40 = vadd.f32 %v1134_v38, %v1133_v35 }
 0x214   : > { %1124 = vadd.xlane.f32.xlu0 %v1123_v39  ;;  %v1137_v42 = vadd.f32 %v1136_v41, %v1135_v40 }
 0x218   : > { %1138 = vadd.xlane.f32.xlu0 %v1137_v42 }
 0x2a1   : > { %v1125_v43 = vpop.xlane.xlu0 %1124 }
 0x2a2   : > { %v1126_v44 = vmul.f32 0.001953125, %v1125_v43 }
 0x2a4   : > { %v1141_v46 = vmul.f32 %v1126_v44, %v1126_v44  ;;  %v1145_v56 = vsub.f32 %v1728_v18, %v1126_v44  ;;  %v1146_v57 = vsub.f32 %v1729_v22, %v1126_v44  ;;  %v1147_v58 = vsub.f32 %v1730_v21, %v1126_v44 }
 0x2a5   : > { %v1139_v45 = vpop.xlane.xlu0 %1138  ;;  %v1148_v59 = vsub.f32 %v1731_v28, %v1126_v44 }
 0x2a6   : > { %v1140_v47 = vmul.f32 0.001953125, %v1139_v45 }
 0x2a8   : > { %v1142_v48 = vsub.f32 %v1140_v47, %v1141_v46 }
 0x2aa   : > { %v1143_v49 = vadd.f32 1e-05, %v1142_v48 }
 0x2ac   : > { %1792 = vrsqrt.f32 %v1143_v49 }
 0x2b6   : > { %v1793_v60 = vpop.eup %1792 }
 0x2b7   : > { %v1149_v1 = vmul.f32 %v1793_v60, %v1145_v56  ;;  %v1150_v2 = vmul.f32 %v1793_v60, %v1146_v57  ;;  %v1151_v3 = vmul.f32 %v1793_v60, %v1147_v58  ;;  %v1152_v4 = vmul.f32 %v1793_v60, %v1148_v59 }
 0x2b9   : > { %v1175_v5 = vmul.f32 %v1158_v52, %v1149_v1  ;;  %v1176_v6 = vmul.f32 %v1162_v54, %v1150_v2  ;;  %v1177_v7 = vmul.f32 %v1166_v53, %v1151_v3  ;;  %v1178_v9 = vmul.f32 %v1170_v55, %v1152_v4 }
 0x2bb   : > { %v1201_v13 = vadd.f32 %v1184_v61, %v1175_v5  ;;  %v1202_v14 = vadd.f32 %v1188_v63, %v1176_v6  ;;  %v1203_v15 = vadd.f32 %v1192_v62, %v1177_v7  ;;  %v1204_v16 = vadd.f32 %v1196_v0, %v1178_v9 }
 0x2bd   : > { %v1209_v8 = vmul.f32 0.70710677, %v1201_v13  ;;  %v1210_v17 = vmul.f32 0.70710677, %v1202_v14  ;;  %v1211_v10 = vmul.f32 0.70710677, %v1203_v15 }
 0x2be   : > { %v1212_v18 = vmul.f32 0.70710677, %v1204_v16  ;;  %v1205_v19 = vmul.f32 0.5, %v1201_v13  ;;  %v1206_v22 = vmul.f32 0.5, %v1202_v14  ;;  %v1207_v25 = vmul.f32 0.5, %v1203_v15 }
 0x2bf   : > { %1794 = verf.f32 %v1209_v8  ;;  %v1208_v28 = vmul.f32 0.5, %v1204_v16 }
 0x2c0   : > { %1796 = verf.f32 %v1210_v17 }
 0x2c1   : > { %1798 = verf.f32 %v1211_v10 }
 0x2c2   : > { %1800 = verf.f32 %v1212_v18 }
 0x2c9   : > { %v1795_v11 = vpop.eup %1794 }
 0x2ca   : > { %v1797_v12 = vpop.eup %1796  ;;  %v1217_v20 = vadd.f32 1.0, %v1795_v11 }
 0x2cb   : > { %v1799_v21 = vpop.eup %1798  ;;  %v1218_v23 = vadd.f32 1.0, %v1797_v12 }
 0x2cc   : > { %v1801_v24 = vpop.eup %1800  ;;  %v1219_v26 = vadd.f32 1.0, %v1799_v21  ;;  %v1221_v27 = vmul.f32 %v1217_v20, %v1205_v19 }
 0x2cd   : > { %v1220_v29 = vadd.f32 1.0, %v1801_v24  ;;  %v1222_v30 = vmul.f32 %v1218_v23, %v1206_v22 }
 0x2ce   : > { %v1223_v31 = vmul.f32 %v1219_v26, %v1207_v25  ;;  %1225 = vst [vmem:[%s277_s15] sm:$0x3f] %v1221_v27 }
 0x2cf   : > { %v1224_v32 = vmul.f32 %v1220_v29, %v1208_v28  ;;  %1226 = vst [vmem:[%s277_s15 + $0x8] sm:$0x3f] %v1222_v30 }
 0x2d0   : > { %1227 = vst [vmem:[%s277_s15 + $0x10] sm:$0x3f] %v1223_v31 }
 0x2d1   : > { %1228 = vst [vmem:[%s277_s15 + $0x18] sm:$0x3f] %v1224_v32 }
 0x2d2 PF: > { %s18_s18 = sadd.s32 1, %s1932_s18  }
 0x2d3   : > { %p15_p6 = scmp.ge.s32.totalorder %s18_s18, 4  }
 0x2d5   :  { %17 = sbr.rel (!%p15_p6) target bundleno = 3 (0x3), region = 87 }
 0x2dc   :  { %1250 = vsyncpa [#allocation3], 1 }
 0x2dd   :  { %1252 = vsyncpa [#allocation3 + $0x1], 1 }
 0x2de   :  { %1253 = vsyncpa [#allocation5], 1 }
 0x2df   :  { %1254 = vsyncpa [#allocation8], 1 }

</bundles_post_ra>
